<compile_context>
chip_gen: v7x
topology: tpu7x:2x2x1
jax: 0.10.0
libtpu: 0.0.40
codegen_flags: <defaults>
</compile_context>

<pallas_src>
import jax
import jax.numpy as jnp
from jax import lax
from jax.experimental import pallas as pl
from jax.experimental.pallas import tpu as pltpu
import numpy as np

# Conservative cross-generation VMEM budget (v7x has 64 MiB physical per TC; leave
# headroom for weights / compiler scratch).  The explicit vmem_limit_bytes raises
# the scoped limit (default 16 MiB on v5e, 32 MiB on v6e/v7x) so budget-sized
# tiles actually compile.
_VMEM_BUDGET = 48 * 1024 * 1024
_VMEM_LIMIT = 64 * 1024 * 1024


def _largest_divisor_not_exceeding(n, cap):
    cap = max(1, min(n, cap))
    for d in range(cap, 0, -1):
        if n % d == 0:
            return d
    return 1


# ----------------------------------------------------------------------------
# Kernel 1: batched input projection  gates_x = x @ W_ih^T + bias  (time-major)
# ----------------------------------------------------------------------------
def input_proj_kernel(x_ref, wih_ref, bias_ref, gx_ref):
    # x_ref:    (TT1, B, D)  f32  time-major input tile
    # wih_ref:  (D, 4H)      bf16
    # bias_ref: (1, 4H)      f32  (b_ih + b_hh)
    # gx_ref:   (TT1, B, 4H) bf16 time-major pre-activations
    TT1, B, D = x_ref.shape
    G = gx_ref.shape[-1]
    # Time-major in, time-major out: merging the leading dims is contiguous, so
    # no in-kernel transpose / relayout is needed.
    x2d = x_ref[...].reshape(TT1 * B, D).astype(jnp.bfloat16)
    g = jnp.dot(x2d, wih_ref[...], preferred_element_type=jnp.float32)
    g = g + bias_ref[...]                                      # bias added once here
    gx_ref[...] = g.reshape(TT1, B, G).astype(gx_ref.dtype)


def input_proj_forward(x_tm, wih_t, bias):
    T_pad, B, D = x_tm.shape
    G = wih_t.shape[1]
    # Budget-driven time tile: double-buffered f32 input rows + bf16 output rows.
    bytes_per_row = B * D * 4 + B * G * 2
    cap = max(1, _VMEM_BUDGET // (2 * bytes_per_row))
    TT1 = _largest_divisor_not_exceeding(T_pad, min(cap, 512))
    return pl.pallas_call(
        input_proj_kernel,
        out_shape=jax.ShapeDtypeStruct((T_pad, B, G), jnp.bfloat16),
        grid=(T_pad // TT1,),
        in_specs=[
            pl.BlockSpec((TT1, B, D), lambda t: (t, 0, 0)),
            pl.BlockSpec((D, G), lambda t: (0, 0)),
            pl.BlockSpec((1, G), lambda t: (0, 0)),
        ],
        out_specs=pl.BlockSpec((TT1, B, G), lambda t: (t, 0, 0)),
        compiler_params=pltpu.CompilerParams(
            dimension_semantics=("parallel",),
            vmem_limit_bytes=_VMEM_LIMIT),
    )(x_tm, wih_t, bias)


# ----------------------------------------------------------------------------
# Kernel 2: LSTM recurrence, TT2 timesteps per grid step, batch-split outer axis.
# ----------------------------------------------------------------------------
def lstm_recurrent_kernel(gx_ref, whh_ref, out_ref, h_scr, c_scr):
    # gx_ref:  (TT2, TBc, 4H) bf16  precomputed x@W_ih^T + bias for TT2 steps
    # whh_ref: (H, 4H)        bf16
    # out_ref: (TT2, TBc, H)  bf16  hidden states for these steps
    # h_scr/c_scr: (TBc, H)   f32   scratch, persistent across the time grid axis
    t = pl.program_id(1)
    TT2 = gx_ref.shape[0]
    H = h_scr.shape[1]

    @pl.when(t == 0)
    def _init():
        # Re-fires for every batch tile since time is the inner ("arbitrary") axis.
        h_scr[...] = jnp.zeros_like(h_scr)
        c_scr[...] = jnp.zeros_like(c_scr)

    whh = whh_ref[...]      # hoisted out of the unrolled step loop

    def step(i, carry):
        h, c = carry
        # TODO(synk): h->bf16 cast error compounds over very long T; validate or
        #             switch the recurrent matmul to f32 for production T.
        gates = gx_ref[i].astype(jnp.float32) + jnp.dot(
            h.astype(jnp.bfloat16), whh, preferred_element_type=jnp.float32)
        # TODO(synk): for non-128-multiple H these gate slices are lane-misaligned.
        i_g = jax.nn.sigmoid(gates[:, 0 * H:1 * H])
        f_g = jax.nn.sigmoid(gates[:, 1 * H:2 * H])
        g_g = jnp.tanh(gates[:, 2 * H:3 * H])
        o_g = jax.nn.sigmoid(gates[:, 3 * H:4 * H])
        c_new = f_g * c + i_g * g_g
        h_new = o_g * jnp.tanh(c_new)
        out_ref[i] = h_new.astype(out_ref.dtype)
        return (h_new, c_new)

    # Multi-timestep inner loop amortizes the fixed per-grid-step overhead; h/c
    # stay in vregs across the unrolled steps and hit VMEM scratch once per tile.
    h_fin, c_fin = lax.fori_loop(0, TT2, step, (h_scr[...], c_scr[...]),
                                 unroll=True)
    h_scr[...] = h_fin
    c_scr[...] = c_fin


def lstm_recurrent_forward(gates_x, whh_t, time_tile):
    T_pad, B, G = gates_x.shape
    H = whh_t.shape[0]
    # Megacore (v7x): split the batch across a leading "parallel" axis only when
    # each half still keeps the MXU reasonably fed.
    TBc = B // 2 if (B >= 256 and B % 16 == 0) else B
    return pl.pallas_call(
        lstm_recurrent_kernel,
        out_shape=jax.ShapeDtypeStruct((T_pad, B, H), jnp.bfloat16),
        grid=(B // TBc, T_pad // time_tile),
        in_specs=[
            pl.BlockSpec((time_tile, TBc, G), lambda b, t: (t, b, 0)),
            pl.BlockSpec((H, G), lambda b, t: (0, 0)),
        ],
        out_specs=pl.BlockSpec((time_tile, TBc, H), lambda b, t: (t, b, 0)),
        scratch_shapes=[
            pltpu.VMEM((TBc, H), jnp.float32),   # h
            pltpu.VMEM((TBc, H), jnp.float32),   # c
        ],
        compiler_params=pltpu.CompilerParams(
            dimension_semantics=("parallel", "arbitrary"),
            vmem_limit_bytes=_VMEM_LIMIT),
    )(gates_x, whh_t)


# ----------------------------------------------------------------------------
# Kernel 3: self-attention over LSTM outputs (B-tiled) + final linear head.
# ----------------------------------------------------------------------------
def attn_fc_kernel(lstm_ref, wattn_ref, battn_ref, wfc1_ref, wfc2_ref, bfc_ref,
                   out_ref, weights_ref):
    # lstm_ref:  (T, TB, H) bf16 time-major LSTM output tile
    # wattn_ref: (H, H) bf16     battn_ref: (1, H) f32
    # wfc1_ref:  (H, O) bf16 (acts on last hidden state)
    # wfc2_ref:  (H, O) bf16 (acts on last-row context)
    # bfc_ref:   (1, O) f32
    # out_ref:     (TB, O)   f32
    # weights_ref: (TB, T*T) f32  (lane-dense; reshaped to (B,T,T) by the wrapper)
    T, TB, H = lstm_ref.shape
    lstm_tm = lstm_ref[...]                                    # (T, TB, H) bf16

    # Attention projection directly on the time-major 2D view (no transpose).
    proj2d = jnp.dot(lstm_tm.reshape(T * TB, H), wattn_ref[...],
                     preferred_element_type=jnp.float32)       # (T*TB, H) f32
    proj_tm = (proj2d + battn_ref[...]).reshape(T, TB, H)

    # Only the batched scores matmul needs a batch-major layout: relayout the two
    # bf16 operands once; no resident f32 copy of the lstm tile is kept.
    lstm_bth = jnp.swapaxes(lstm_tm, 0, 1)                     # (TB, T, H) bf16
    proj_bth = jnp.swapaxes(proj_tm.astype(jnp.bfloat16), 0, 1)

    # scores[b, t, s] = <lstm[b, t], proj[b, s]>
    scores = jnp.einsum('bth,bsh->bts', lstm_bth, proj_bth,
                        preferred_element_type=jnp.float32)    # (TB, T, T) f32
    m = jnp.max(scores, axis=-1, keepdims=True)
    e = jnp.exp(scores - m)
    denom = jnp.sum(e, axis=-1, keepdims=True)
    w = e / denom          # exact normalization: returned weight rows sum to 1
    weights_ref[...] = w.reshape(TB, T * T)                    # lane-dense store

    # Only the last query row's context is consumed by the FC head.
    last_h = lstm_ref[T - 1]                                   # (TB, H) bf16
    w_last = w[:, T - 1:T, :].astype(jnp.bfloat16)             # (TB, 1, T)
    ctx_last = jnp.einsum('bqt,bth->bqh', w_last, lstm_bth,
                          preferred_element_type=jnp.float32)[:, 0, :]   # (TB, H)

    # fc(cat(last_h, ctx_last)) == last_h @ Wfc1 + ctx_last @ Wfc2 + b
    out_ref[...] = (
        jnp.dot(last_h, wfc1_ref[...], preferred_element_type=jnp.float32)
        + jnp.dot(ctx_last.astype(jnp.bfloat16), wfc2_ref[...],
                  preferred_element_type=jnp.float32)
        + bfc_ref[...]
    )


def _pick_attn_batch_tile(B, T, H):
    if B <= 8:
        return B
    # Per batch-row VMEM: 2x-buffered bf16 lstm in + bf16 batch-major copies
    # (lstm_bth, proj_bth) + f32 scores/e/w + 2x-buffered f32 flat weights out.
    bytes_per_b = (2 * T * H * 2) + (2 * T * H * 2) + (3 * T * T * 4) + (2 * T * T * 4)
    cap = max(8, _VMEM_BUDGET // max(1, bytes_per_b))
    cap = min((cap // 8) * 8, B)
    for d in range(cap, 7, -8):
        if B % d == 0:
            return d
    # TODO(synk): pad B up to a multiple of 8 instead of falling back to full B.
    return B


def attn_fc_forward(lstm_tm, wattn_t, battn, wfc1, wfc2, bfc):
    T, B, H = lstm_tm.shape
    O = wfc1.shape[1]
    TB = _pick_attn_batch_tile(B, T, H)
    out, w_flat = pl.pallas_call(
        attn_fc_kernel,
        out_shape=(
            jax.ShapeDtypeStruct((B, O), jnp.float32),
            jax.ShapeDtypeStruct((B, T * T), jnp.float32),
        ),
        grid=(B // TB,),
        in_specs=[
            pl.BlockSpec((T, TB, H), lambda b: (0, b, 0)),
            pl.BlockSpec((H, H), lambda b: (0, 0)),
            pl.BlockSpec((1, H), lambda b: (0, 0)),
            pl.BlockSpec((H, O), lambda b: (0, 0)),
            pl.BlockSpec((H, O), lambda b: (0, 0)),
            pl.BlockSpec((1, O), lambda b: (0, 0)),
        ],
        out_specs=(
            pl.BlockSpec((TB, O), lambda b: (b, 0)),
            pl.BlockSpec((TB, T * T), lambda b: (b, 0)),
        ),
        compiler_params=pltpu.CompilerParams(
            dimension_semantics=("parallel",),
            vmem_limit_bytes=_VMEM_LIMIT),
    )(lstm_tm, wattn_t, battn, wfc1, wfc2, bfc)
    return out, w_flat.reshape(B, T, T)


# ----------------------------------------------------------------------------
# Full module forward (glue in plain JAX).
# ----------------------------------------------------------------------------
def lstm_with_attention_forward(x, params):
    """x: (B, T, input_dim). Returns (out (B, output_dim), attn_weights (B, T, T))."""
    W_ih, W_hh, b_ih, b_hh, W_attn, b_attn, W_fc, b_fc = params
    B, T, D = x.shape
    H = W_hh.shape[1]

    # Weight prep (small, one-time): transpose + bf16 cast for the MXU side.
    wih_t = W_ih.T.astype(jnp.bfloat16)                        # (D, 4H)
    whh_t = W_hh.T.astype(jnp.bfloat16)                        # (H, 4H)
    bias = (b_ih + b_hh).reshape(1, -1).astype(jnp.float32)    # (1, 4H)

    # Time-major input; pad T up to a multiple of the recurrence time tile so the
    # grid never degenerates for prime/odd T (padded steps are dropped later).
    TT2 = T if T <= 16 else 16
    T_pad = -(-T // TT2) * TT2
    x_tm = jnp.swapaxes(x, 0, 1).astype(jnp.float32)           # (T, B, D)
    if T_pad != T:
        x_tm = jnp.pad(x_tm, ((0, T_pad - T), (0, 0), (0, 0)))

    # ---- LSTM: batched input projection, then serial recurrence ----
    gates_x = input_proj_forward(x_tm, wih_t, bias)            # (T_pad, B, 4H) bf16
    lstm_tm = lstm_recurrent_forward(gates_x, whh_t, TT2)      # (T_pad, B, H)  bf16
    if T_pad != T:
        lstm_tm = lstm_tm[:T]

    # dropout (eval mode) == identity
    # TODO(synk): train-mode dropout (Bernoulli masking) is not implemented.

    # ---- attention + fc ----
    wattn_t = W_attn.T.astype(jnp.bfloat16)                    # (H, H)
    battn = b_attn.reshape(1, -1).astype(jnp.float32)          # (1, H)
    wfc1 = W_fc[:, :H].T.astype(jnp.bfloat16)                  # (H, O)
    wfc2 = W_fc[:, H:].T.astype(jnp.bfloat16)                  # (H, O)
    bfc = b_fc.reshape(1, -1).astype(jnp.float32)              # (1, O)
    return attn_fc_forward(lstm_tm, wattn_t, battn, wfc1, wfc2, bfc)


# ----------------------------------------------------------------------------
# Pure-JAX f32 reference (same math) for a correctness check.
# ----------------------------------------------------------------------------
def reference_forward(x, params):
    W_ih, W_hh, b_ih, b_hh, W_attn, b_attn, W_fc, b_fc = params
    B, T, _ = x.shape
    H = W_hh.shape[1]

    def step(carry, x_t):
        h, c = carry
        gates = x_t @ W_ih.T + h @ W_hh.T + b_ih + b_hh
        i = jax.nn.sigmoid(gates[:, 0 * H:1 * H])
        f = jax.nn.sigmoid(gates[:, 1 * H:2 * H])
        g = jnp.tanh(gates[:, 2 * H:3 * H])
        o = jax.nn.sigmoid(gates[:, 3 * H:4 * H])
        c = f * c + i * g
        h = o * jnp.tanh(c)
        return (h, c), h

    init = (jnp.zeros((B, H), jnp.float32), jnp.zeros((B, H), jnp.float32))
    _, hs = lax.scan(step, init, jnp.swapaxes(x, 0, 1))
    lstm_out = jnp.swapaxes(hs, 0, 1)                          # (B, T, H)

    proj = lstm_out @ W_attn.T + b_attn
    scores = jnp.einsum('bth,bsh->bts', lstm_out, proj)
    w = jax.nn.softmax(scores, axis=-1)
    ctx = jnp.einsum('bts,bsh->bth', w, lstm_out)
    combined = jnp.concatenate([lstm_out[:, -1, :], ctx[:, -1, :]], axis=1)
    out = combined @ W_fc.T + b_fc
    return out, w


if __name__ == "__main__":
    # Small shapes implied by the module's forward: (batch, seq, input_dim)
    B, T, D, H, O = 2, 8, 16, 32, 4

    key = jax.random.PRNGKey(0)
    ks = jax.random.split(key, 9)
    s = 0.1
    W_ih = s * jax.random.normal(ks[0], (4 * H, D), jnp.float32)
    W_hh = s * jax.random.normal(ks[1], (4 * H, H), jnp.float32)
    b_ih = s * jax.random.normal(ks[2], (4 * H,), jnp.float32)
    b_hh = s * jax.random.normal(ks[3], (4 * H,), jnp.float32)
    W_attn = s * jax.random.normal(ks[4], (H, H), jnp.float32)
    b_attn = s * jax.random.normal(ks[5], (H,), jnp.float32)
    W_fc = s * jax.random.normal(ks[6], (O, 2 * H), jnp.float32)
    b_fc = s * jax.random.normal(ks[7], (O,), jnp.float32)
    params = (W_ih, W_hh, b_ih, b_hh, W_attn, b_attn, W_fc, b_fc)

    x = jax.random.normal(ks[8], (B, T, D), jnp.float32)

    fwd = jax.jit(lstm_with_attention_forward)
    out, attn_w = fwd(x, params)
    jax.block_until_ready((out, attn_w))

    out_ref, attn_w_ref = reference_forward(x, params)
    assert out.shape == (B, O) and attn_w.shape == (B, T, T)
    # bf16 MXU inputs / bf16 intermediates (f32 accumulation) -> loose tolerance.
    np.testing.assert_allclose(np.asarray(out), np.asarray(out_ref),
                               rtol=3e-2, atol=3e-2)
    np.testing.assert_allclose(np.asarray(attn_w), np.asarray(attn_w_ref),
                               rtol=3e-2, atol=3e-2)

    print("KERNEL_OK")
</pallas_src>

<mosaic_0001>
module attributes {stable_mosaic.version = 11 : i64} {
  func.func @input_proj_kernel(%arg0: i32, %arg1: memref<8x2x16xf32, #tpu.memory_space<vmem>>, %arg2: memref<16x128xbf16, #tpu.memory_space<vmem>>, %arg3: memref<1x128xf32, #tpu.memory_space<vmem>>, %arg4: memref<8x2x128xbf16, #tpu.memory_space<vmem>>) attributes {dimension_semantics = [#tpu.dimension_semantics<parallel>], iteration_bounds = array<i64: 1>, scalar_prefetch = 0 : i64, scratch_operands = 0 : i64, tpu.core_type = #tpu.core_type<tc>, window_params = [{transform_indices = @transform_0, window_bounds = array<i64: 8, 2, 16>}, {pipeline_mode = #tpu.pipeline_mode<synchronous>, transform_indices = @transform_1, window_bounds = array<i64: 16, 128>}, {pipeline_mode = #tpu.pipeline_mode<synchronous>, transform_indices = @transform_2, window_bounds = array<i64: 1, 128>}, {transform_indices = @transform_3, window_bounds = array<i64: 8, 2, 128>}]} {
    %c0 = arith.constant 0 : index
    %c0_0 = arith.constant 0 : index
    %c0_1 = arith.constant 0 : index
    %0 = vector.load %arg1[%c0, %c0_0, %c0_1] : memref<8x2x16xf32, #tpu.memory_space<vmem>>, vector<8x2x16xf32>
    %1 = vector.shape_cast %0 : vector<8x2x16xf32> to vector<16x16xf32>
    %2 = arith.truncf %1 : vector<16x16xf32> to vector<16x16xbf16>
    %c0_2 = arith.constant 0 : index
    %c0_3 = arith.constant 0 : index
    %3 = vector.load %arg2[%c0_2, %c0_3] : memref<16x128xbf16, #tpu.memory_space<vmem>>, vector<16x128xbf16>
    %cst = arith.constant dense<0.000000e+00> : vector<16x128xf32>
    %4 = tpu.matmul %2, %3, %cst {dimension_numbers = #tpu.dot_dimension_numbers<[1], [0], [0], [1], [0, 0, 1, 1], [], []>} : vector<16x16xbf16>, vector<16x128xbf16>, vector<16x128xf32> -> vector<16x128xf32>
    %c0_4 = arith.constant 0 : index
    %c0_5 = arith.constant 0 : index
    %5 = vector.load %arg3[%c0_4, %c0_5] : memref<1x128xf32, #tpu.memory_space<vmem>>, vector<1x128xf32>
    %6 = vector.broadcast %5 : vector<1x128xf32> to vector<16x128xf32>
    %7 = arith.addf %4, %6 : vector<16x128xf32>
    %8 = vector.shape_cast %7 : vector<16x128xf32> to vector<8x2x128xf32>
    %9 = arith.truncf %8 : vector<8x2x128xf32> to vector<8x2x128xbf16>
    %c0_6 = arith.constant 0 : index
    %c0_7 = arith.constant 0 : index
    %c0_8 = arith.constant 0 : index
    %10 = vector.load %arg4[%c0_6, %c0_7, %c0_8] : memref<8x2x128xbf16, #tpu.memory_space<vmem>>, vector<8x2x128xbf16>
    tpu.vector_store %arg4[%c0_6, %c0_7, %c0_8], %9 {strides = array<i32>} : memref<8x2x128xbf16, #tpu.memory_space<vmem>>, vector<8x2x128xbf16>,
    return
  }
  func.func @transform_0(%arg0: i32) -> (i32, i32, i32) {
    %c0_i32 = arith.constant 0 : i32
    %c0_i32_0 = arith.constant 0 : i32
    %c0_i32_1 = arith.constant 0 : i32
    return %arg0, %c0_i32, %c0_i32_0 : i32, i32, i32
  }
  func.func @transform_1(%arg0: i32) -> (i32, i32) {
    %c0_i32 = arith.constant 0 : i32
    %c0_i32_0 = arith.constant 0 : i32
    %c0_i32_1 = arith.constant 0 : i32
    return %c0_i32, %c0_i32_0 : i32, i32
  }
  func.func @transform_2(%arg0: i32) -> (i32, i32) {
    %c0_i32 = arith.constant 0 : i32
    %c0_i32_0 = arith.constant 0 : i32
    %c0_i32_1 = arith.constant 0 : i32
    return %c0_i32, %c0_i32_0 : i32, i32
  }
  func.func @transform_3(%arg0: i32) -> (i32, i32, i32) {
    %c0_i32 = arith.constant 0 : i32
    %c0_i32_0 = arith.constant 0 : i32
    %c0_i32_1 = arith.constant 0 : i32
    return %arg0, %c0_i32, %c0_i32_0 : i32, i32, i32
  }
}

module attributes {stable_mosaic.version = 11 : i64} {
  func.func @attn_fc_kernel(%arg0: i32, %arg1: memref<8x2x32xbf16, #tpu.memory_space<vmem>>, %arg2: memref<32x32xbf16, #tpu.memory_space<vmem>>, %arg3: memref<1x32xf32, #tpu.memory_space<vmem>>, %arg4: memref<32x4xbf16, #tpu.memory_space<vmem>>, %arg5: memref<32x4xbf16, #tpu.memory_space<vmem>>, %arg6: memref<1x4xf32, #tpu.memory_space<vmem>>, %arg7: memref<2x4xf32, #tpu.memory_space<vmem>>, %arg8: memref<2x64xf32, #tpu.memory_space<vmem>>) attributes {dimension_semantics = [#tpu.dimension_semantics<parallel>], iteration_bounds = array<i64: 1>, scalar_prefetch = 0 : i64, scratch_operands = 0 : i64, tpu.core_type = #tpu.core_type<tc>, window_params = [{transform_indices = @transform_0, window_bounds = array<i64: 8, 2, 32>}, {pipeline_mode = #tpu.pipeline_mode<synchronous>, transform_indices = @transform_1, window_bounds = array<i64: 32, 32>}, {pipeline_mode = #tpu.pipeline_mode<synchronous>, transform_indices = @transform_2, window_bounds = array<i64: 1, 32>}, {pipeline_mode = #tpu.pipeline_mode<synchronous>, transform_indices = @transform_3, window_bounds = array<i64: 32, 4>}, {pipeline_mode = #tpu.pipeline_mode<synchronous>, transform_indices = @transform_4, window_bounds = array<i64: 32, 4>}, {pipeline_mode = #tpu.pipeline_mode<synchronous>, transform_indices = @transform_5, window_bounds = array<i64: 1, 4>}, {transform_indices = @transform_6, window_bounds = array<i64: 2, 4>}, {transform_indices = @transform_7, window_bounds = array<i64: 2, 64>}]} {
    %c0 = arith.constant 0 : index
    %c0_0 = arith.constant 0 : index
    %c0_1 = arith.constant 0 : index
    %0 = vector.load %arg1[%c0, %c0_0, %c0_1] : memref<8x2x32xbf16, #tpu.memory_space<vmem>>, vector<8x2x32xbf16>
    %1 = vector.shape_cast %0 : vector<8x2x32xbf16> to vector<16x32xbf16>
    %c0_2 = arith.constant 0 : index
    %c0_3 = arith.constant 0 : index
    %2 = vector.load %arg2[%c0_2, %c0_3] : memref<32x32xbf16, #tpu.memory_space<vmem>>, vector<32x32xbf16>
    %cst = arith.constant dense<0.000000e+00> : vector<16x32xf32>
    %3 = tpu.matmul %1, %2, %cst {dimension_numbers = #tpu.dot_dimension_numbers<[1], [0], [0], [1], [0, 0, 1, 1], [], []>} : vector<16x32xbf16>, vector<32x32xbf16>, vector<16x32xf32> -> vector<16x32xf32>
    %c0_4 = arith.constant 0 : index
    %c0_5 = arith.constant 0 : index
    %4 = vector.load %arg3[%c0_4, %c0_5] : memref<1x32xf32, #tpu.memory_space<vmem>>, vector<1x32xf32>
    %5 = vector.broadcast %4 : vector<1x32xf32> to vector<16x32xf32>
    %6 = arith.addf %3, %5 : vector<16x32xf32>
    %7 = vector.shape_cast %6 : vector<16x32xf32> to vector<8x2x32xf32>
    %8 = tpu.transpose %0, [1, 0, 2] : vector<8x2x32xbf16> -> vector<2x8x32xbf16>
    %9 = arith.truncf %7 : vector<8x2x32xf32> to vector<8x2x32xbf16>
    %10 = tpu.transpose %9, [1, 0, 2] : vector<8x2x32xbf16> -> vector<2x8x32xbf16>
    "tpu.trace_start"() <{level = 10 : i32, message = "bth,bsh->bts"}> : () -> ()
    %cst_6 = arith.constant dense<0.000000e+00> : vector<2x8x8xf32>
    %11 = tpu.matmul %8, %10, %cst_6 {dimension_numbers = #tpu.dot_dimension_numbers<[2], [2], [1], [1], [0, 0, 0, 1, 1, 1], [0], [0]>} : vector<2x8x32xbf16>, vector<2x8x32xbf16>, vector<2x8x8xf32> -> vector<2x8x8xf32>
    "tpu.trace_stop"() : () -> ()
    %cst_7 = arith.constant dense<0xFF800000> : vector<2x8xf32>
    %12 = vector.multi_reduction <maximumf>, %11, %cst_7 [2] : vector<2x8x8xf32> to vector<2x8xf32>
    %13 = vector.shape_cast %12 : vector<2x8xf32> to vector<2x8x1xf32>
    %14 = vector.broadcast %13 : vector<2x8x1xf32> to vector<2x8x8xf32>
    %15 = arith.subf %11, %14 : vector<2x8x8xf32>
    %16 = math.exp %15 : vector<2x8x8xf32>
    %cst_8 = arith.constant dense<0.000000e+00> : vector<2x8xf32>
    %17 = vector.multi_reduction <add>, %16, %cst_8 [2] : vector<2x8x8xf32> to vector<2x8xf32>
    %18 = vector.shape_cast %17 : vector<2x8xf32> to vector<2x8x1xf32>
    %19 = vector.broadcast %18 : vector<2x8x1xf32> to vector<2x8x8xf32>
    %20 = arith.divf %16, %19 : vector<2x8x8xf32>
    %21 = vector.shape_cast %20 : vector<2x8x8xf32> to vector<2x64xf32>
    %c0_9 = arith.constant 0 : index
    %c0_10 = arith.constant 0 : index
    %22 = vector.load %arg8[%c0_9, %c0_10] : memref<2x64xf32, #tpu.memory_space<vmem>>, vector<2x64xf32>
    tpu.vector_store %arg8[%c0_9, %c0_10], %21 {strides = array<i32>} : memref<2x64xf32, #tpu.memory_space<vmem>>, vector<2x64xf32>,
    %c7 = arith.constant 7 : index
    %c0_11 = arith.constant 0 : index
    %c0_12 = arith.constant 0 : index
    %23 = vector.load %arg1[%c7, %c0_11, %c0_12] : memref<8x2x32xbf16, #tpu.memory_space<vmem>>, vector<1x2x32xbf16>
    %24 = vector.shape_cast %23 : vector<1x2x32xbf16> to vector<2x32xbf16>
    %25 = vector.extract_strided_slice %20 {offsets = [0, 7, 0], sizes = [2, 1, 8], strides = [1, 1, 1]} : vector<2x8x8xf32> to vector<2x1x8xf32>
    %26 = arith.truncf %25 : vector<2x1x8xf32> to vector<2x1x8xbf16>
    "tpu.trace_start"() <{level = 10 : i32, message = "bqt,bth->bqh"}> : () -> ()
    %cst_13 = arith.constant dense<0.000000e+00> : vector<2x1x32xf32>
    %27 = tpu.matmul %26, %8, %cst_13 {dimension_numbers = #tpu.dot_dimension_numbers<[2], [1], [1], [2], [0, 0, 0, 1, 1, 2], [0], [0]>} : vector<2x1x8xbf16>, vector<2x8x32xbf16>, vector<2x1x32xf32> -> vector<2x1x32xf32>
    "tpu.trace_stop"() : () -> ()
    %28 = vector.shape_cast %27 : vector<2x1x32xf32> to vector<2x32xf32>
    %c0_14 = arith.constant 0 : index
    %c0_15 = arith.constant 0 : index
    %29 = vector.load %arg4[%c0_14, %c0_15] : memref<32x4xbf16, #tpu.memory_space<vmem>>, vector<32x4xbf16>
    %cst_16 = arith.constant dense<0.000000e+00> : vector<2x4xf32>
    %30 = tpu.matmul %24, %29, %cst_16 {dimension_numbers = #tpu.dot_dimension_numbers<[1], [0], [0], [1], [0, 0, 1, 1], [], []>} : vector<2x32xbf16>, vector<32x4xbf16>, vector<2x4xf32> -> vector<2x4xf32>
    %31 = arith.truncf %28 : vector<2x32xf32> to vector<2x32xbf16>
    %c0_17 = arith.constant 0 : index
    %c0_18 = arith.constant 0 : index
    %32 = vector.load %arg5[%c0_17, %c0_18] : memref<32x4xbf16, #tpu.memory_space<vmem>>, vector<32x4xbf16>
    %cst_19 = arith.constant dense<0.000000e+00> : vector<2x4xf32>
    %33 = tpu.matmul %31, %32, %cst_19 {dimension_numbers = #tpu.dot_dimension_numbers<[1], [0], [0], [1], [0, 0, 1, 1], [], []>} : vector<2x32xbf16>, vector<32x4xbf16>, vector<2x4xf32> -> vector<2x4xf32>
    %34 = arith.addf %30, %33 : vector<2x4xf32>
    %c0_20 = arith.constant 0 : index
    %c0_21 = arith.constant 0 : index
    %35 = vector.load %arg6[%c0_20, %c0_21] : memref<1x4xf32, #tpu.memory_space<vmem>>, vector<1x4xf32>
    %36 = vector.broadcast %35 : vector<1x4xf32> to vector<2x4xf32>
    %37 = arith.addf %34, %36 : vector<2x4xf32>
    %c0_22 = arith.constant 0 : index
    %c0_23 = arith.constant 0 : index
    %38 = vector.load %arg7[%c0_22, %c0_23] : memref<2x4xf32, #tpu.memory_space<vmem>>, vector<2x4xf32>
    tpu.vector_store %arg7[%c0_22, %c0_23], %37 {strides = array<i32>} : memref<2x4xf32, #tpu.memory_space<vmem>>, vector<2x4xf32>,
    return
  }
  func.func @transform_0(%arg0: i32) -> (i32, i32, i32) {
    %c0_i32 = arith.constant 0 : i32
    %c0_i32_0 = arith.constant 0 : i32
    %c0_i32_1 = arith.constant 0 : i32
    return %c0_i32, %arg0, %c0_i32_0 : i32, i32, i32
  }
  func.func @transform_1(%arg0: i32) -> (i32, i32) {
    %c0_i32 = arith.constant 0 : i32
    %c0_i32_0 = arith.constant 0 : i32
    %c0_i32_1 = arith.constant 0 : i32
    return %c0_i32, %c0_i32_0 : i32, i32
  }
  func.func @transform_2(%arg0: i32) -> (i32, i32) {
    %c0_i32 = arith.constant 0 : i32
    %c0_i32_0 = arith.constant 0 : i32
    %c0_i32_1 = arith.constant 0 : i32
    return %c0_i32, %c0_i32_0 : i32, i32
  }
  func.func @transform_3(%arg0: i32) -> (i32, i32) {
    %c0_i32 = arith.constant 0 : i32
    %c0_i32_0 = arith.constant 0 : i32
    %c0_i32_1 = arith.constant 0 : i32
    return %c0_i32, %c0_i32_0 : i32, i32
  }
  func.func @transform_4(%arg0: i32) -> (i32, i32) {
    %c0_i32 = arith.constant 0 : i32
    %c0_i32_0 = arith.constant 0 : i32
    %c0_i32_1 = arith.constant 0 : i32
    return %c0_i32, %c0_i32_0 : i32, i32
  }
  func.func @transform_5(%arg0: i32) -> (i32, i32) {
    %c0_i32 = arith.constant 0 : i32
    %c0_i32_0 = arith.constant 0 : i32
    %c0_i32_1 = arith.constant 0 : i32
    return %c0_i32, %c0_i32_0 : i32, i32
  }
  func.func @transform_6(%arg0: i32) -> (i32, i32) {
    %c0_i32 = arith.constant 0 : i32
    %c0_i32_0 = arith.constant 0 : i32
    return %arg0, %c0_i32 : i32, i32
  }
  func.func @transform_7(%arg0: i32) -> (i32, i32) {
    %c0_i32 = arith.constant 0 : i32
    %c0_i32_0 = arith.constant 0 : i32
    return %arg0, %c0_i32 : i32, i32
  }
}

module attributes {stable_mosaic.version = 11 : i64} {
  func.func @lstm_recurrent_kernel(%arg0: i32, %arg1: i32, %arg2: memref<8x2x128xbf16, #tpu.memory_space<vmem>>, %arg3: memref<32x128xbf16, #tpu.memory_space<vmem>>, %arg4: memref<8x2x32xbf16, #tpu.memory_space<vmem>>, %arg5: memref<2x32xf32, #tpu.memory_space<vmem>>, %arg6: memref<2x32xf32, #tpu.memory_space<vmem>>) attributes {dimension_semantics = [#tpu.dimension_semantics<parallel>, #tpu.dimension_semantics<arbitrary>], iteration_bounds = array<i64: 1, 1>, scalar_prefetch = 0 : i64, scratch_operands = 2 : i64, tpu.core_type = #tpu.core_type<tc>, window_params = [{transform_indices = @transform_0, window_bounds = array<i64: 8, 2, 128>}, {pipeline_mode = #tpu.pipeline_mode<synchronous>, transform_indices = @transform_1, window_bounds = array<i64: 32, 128>}, {transform_indices = @transform_2, window_bounds = array<i64: 8, 2, 32>}]} {
    %c0_i32 = arith.constant 0 : i32
    %0 = arith.cmpi eq, %arg1, %c0_i32 : i32
    %1 = arith.extui %0 : i1 to i32
    %c0_i32_0 = arith.constant 0 : i32
    %2 = arith.cmpi ne, %1, %c0_i32_0 : i32
    scf.if %2 {
      %cst_74 = arith.constant 0.000000e+00 : f32
      %304 = vector.broadcast %cst_74 : f32 to vector<2x32xf32>
      %c0_75 = arith.constant 0 : index
      %c0_76 = arith.constant 0 : index
      %305 = vector.load %arg5[%c0_75, %c0_76] : memref<2x32xf32, #tpu.memory_space<vmem>>, vector<2x32xf32>
      tpu.vector_store %arg5[%c0_75, %c0_76], %304 {strides = array<i32>} : memref<2x32xf32, #tpu.memory_space<vmem>>, vector<2x32xf32>,
      %cst_77 = arith.constant 0.000000e+00 : f32
      %306 = vector.broadcast %cst_77 : f32 to vector<2x32xf32>
      %c0_78 = arith.constant 0 : index
      %c0_79 = arith.constant 0 : index
      %307 = vector.load %arg6[%c0_78, %c0_79] : memref<2x32xf32, #tpu.memory_space<vmem>>, vector<2x32xf32>
      tpu.vector_store %arg6[%c0_78, %c0_79], %306 {strides = array<i32>} : memref<2x32xf32, #tpu.memory_space<vmem>>, vector<2x32xf32>,
    } else {
    }
    %c0 = arith.constant 0 : index
    %c0_1 = arith.constant 0 : index
    %3 = vector.load %arg3[%c0, %c0_1] : memref<32x128xbf16, #tpu.memory_space<vmem>>, vector<32x128xbf16>
    %c0_2 = arith.constant 0 : index
    %c0_3 = arith.constant 0 : index
    %4 = vector.load %arg5[%c0_2, %c0_3] : memref<2x32xf32, #tpu.memory_space<vmem>>, vector<2x32xf32>
    %c0_4 = arith.constant 0 : index
    %c0_5 = arith.constant 0 : index
    %5 = vector.load %arg6[%c0_4, %c0_5] : memref<2x32xf32, #tpu.memory_space<vmem>>, vector<2x32xf32>
    %c0_i32_6 = arith.constant 0 : i32
    %6 = arith.index_cast %c0_i32_6 : i32 to index
    %c0_7 = arith.constant 0 : index
    %c0_8 = arith.constant 0 : index
    %7 = vector.load %arg2[%6, %c0_7, %c0_8] : memref<8x2x128xbf16, #tpu.memory_space<vmem>>, vector<1x2x128xbf16>
    %8 = vector.shape_cast %7 : vector<1x2x128xbf16> to vector<2x128xbf16>
    %9 = arith.extf %8 : vector<2x128xbf16> to vector<2x128xf32>
    %10 = arith.truncf %4 : vector<2x32xf32> to vector<2x32xbf16>
    %cst = arith.constant dense<0.000000e+00> : vector<2x128xf32>
    %11 = tpu.matmul %10, %3, %cst {dimension_numbers = #tpu.dot_dimension_numbers<[1], [0], [0], [1], [0, 0, 1, 1], [], []>} : vector<2x32xbf16>, vector<32x128xbf16>, vector<2x128xf32> -> vector<2x128xf32>
    %12 = arith.addf %9, %11 : vector<2x128xf32>
    %13 = vector.extract_strided_slice %12 {offsets = [0, 0], sizes = [2, 32], strides = [1, 1]} : vector<2x128xf32> to vector<2x32xf32>
    %14 = arith.negf %13 : vector<2x32xf32>
    %15 = math.exp %14 : vector<2x32xf32>
    %cst_9 = arith.constant 1.000000e+00 : f32
    %16 = vector.broadcast %cst_9 : f32 to vector<2x32xf32>
    %17 = arith.addf %16, %15 : vector<2x32xf32>
    %18 = arith.divf %16, %17 : vector<2x32xf32>
    %19 = vector.extract_strided_slice %12 {offsets = [0, 32], sizes = [2, 32], strides = [1, 1]} : vector<2x128xf32> to vector<2x32xf32>
    %20 = arith.negf %19 : vector<2x32xf32>
    %21 = math.exp %20 : vector<2x32xf32>
    %cst_10 = arith.constant 1.000000e+00 : f32
    %22 = vector.broadcast %cst_10 : f32 to vector<2x32xf32>
    %23 = arith.addf %22, %21 : vector<2x32xf32>
    %24 = arith.divf %22, %23 : vector<2x32xf32>
    %25 = vector.extract_strided_slice %12 {offsets = [0, 64], sizes = [2, 32], strides = [1, 1]} : vector<2x128xf32> to vector<2x32xf32>
    %26 = math.tanh %25 : vector<2x32xf32>
    %27 = vector.extract_strided_slice %12 {offsets = [0, 96], sizes = [2, 32], strides = [1, 1]} : vector<2x128xf32> to vector<2x32xf32>
    %28 = arith.negf %27 : vector<2x32xf32>
    %29 = math.exp %28 : vector<2x32xf32>
    %cst_11 = arith.constant 1.000000e+00 : f32
    %30 = vector.broadcast %cst_11 : f32 to vector<2x32xf32>
    %31 = arith.addf %30, %29 : vector<2x32xf32>
    %32 = arith.divf %30, %31 : vector<2x32xf32>
    %33 = arith.mulf %24, %5 : vector<2x32xf32>
    %34 = arith.mulf %18, %26 : vector<2x32xf32>
    %35 = arith.addf %33, %34 : vector<2x32xf32>
    %36 = math.tanh %35 : vector<2x32xf32>
    %37 = arith.mulf %32, %36 : vector<2x32xf32>
    %38 = arith.truncf %37 : vector<2x32xf32> to vector<2x32xbf16>
    %39 = arith.index_cast %c0_i32_6 : i32 to index
    %c0_12 = arith.constant 0 : index
    %c0_13 = arith.constant 0 : index
    %40 = vector.load %arg4[%39, %c0_12, %c0_13] : memref<8x2x32xbf16, #tpu.memory_space<vmem>>, vector<1x2x32xbf16>
    %41 = vector.shape_cast %40 : vector<1x2x32xbf16> to vector<2x32xbf16>
    %42 = vector.shape_cast %38 : vector<2x32xbf16> to vector<1x2x32xbf16>
    tpu.vector_store %arg4[%39, %c0_12, %c0_13], %42 {strides = array<i32>} : memref<8x2x32xbf16, #tpu.memory_space<vmem>>, vector<1x2x32xbf16>,
    %c1_i32 = arith.constant 1 : i32
    %43 = arith.index_cast %c1_i32 : i32 to index
    %c0_14 = arith.constant 0 : index
    %c0_15 = arith.constant 0 : index
    %44 = vector.load %arg2[%43, %c0_14, %c0_15] : memref<8x2x128xbf16, #tpu.memory_space<vmem>>, vector<1x2x128xbf16>
    %45 = vector.shape_cast %44 : vector<1x2x128xbf16> to vector<2x128xbf16>
    %46 = arith.extf %45 : vector<2x128xbf16> to vector<2x128xf32>
    %47 = arith.truncf %37 : vector<2x32xf32> to vector<2x32xbf16>
    %cst_16 = arith.constant dense<0.000000e+00> : vector<2x128xf32>
    %48 = tpu.matmul %47, %3, %cst_16 {dimension_numbers = #tpu.dot_dimension_numbers<[1], [0], [0], [1], [0, 0, 1, 1], [], []>} : vector<2x32xbf16>, vector<32x128xbf16>, vector<2x128xf32> -> vector<2x128xf32>
    %49 = arith.addf %46, %48 : vector<2x128xf32>
    %50 = vector.extract_strided_slice %49 {offsets = [0, 0], sizes = [2, 32], strides = [1, 1]} : vector<2x128xf32> to vector<2x32xf32>
    %51 = arith.negf %50 : vector<2x32xf32>
    %52 = math.exp %51 : vector<2x32xf32>
    %cst_17 = arith.constant 1.000000e+00 : f32
    %53 = vector.broadcast %cst_17 : f32 to vector<2x32xf32>
    %54 = arith.addf %53, %52 : vector<2x32xf32>
    %55 = arith.divf %53, %54 : vector<2x32xf32>
    %56 = vector.extract_strided_slice %49 {offsets = [0, 32], sizes = [2, 32], strides = [1, 1]} : vector<2x128xf32> to vector<2x32xf32>
    %57 = arith.negf %56 : vector<2x32xf32>
    %58 = math.exp %57 : vector<2x32xf32>
    %cst_18 = arith.constant 1.000000e+00 : f32
    %59 = vector.broadcast %cst_18 : f32 to vector<2x32xf32>
    %60 = arith.addf %59, %58 : vector<2x32xf32>
    %61 = arith.divf %59, %60 : vector<2x32xf32>
    %62 = vector.extract_strided_slice %49 {offsets = [0, 64], sizes = [2, 32], strides = [1, 1]} : vector<2x128xf32> to vector<2x32xf32>
    %63 = math.tanh %62 : vector<2x32xf32>
    %64 = vector.extract_strided_slice %49 {offsets = [0, 96], sizes = [2, 32], strides = [1, 1]} : vector<2x128xf32> to vector<2x32xf32>
    %65 = arith.negf %64 : vector<2x32xf32>
    %66 = math.exp %65 : vector<2x32xf32>
    %cst_19 = arith.constant 1.000000e+00 : f32
    %67 = vector.broadcast %cst_19 : f32 to vector<2x32xf32>
    %68 = arith.addf %67, %66 : vector<2x32xf32>
    %69 = arith.divf %67, %68 : vector<2x32xf32>
    %70 = arith.mulf %61, %35 : vector<2x32xf32>
    %71 = arith.mulf %55, %63 : vector<2x32xf32>
    %72 = arith.addf %70, %71 : vector<2x32xf32>
    %73 = math.tanh %72 : vector<2x32xf32>
    %74 = arith.mulf %69, %73 : vector<2x32xf32>
    %75 = arith.truncf %74 : vector<2x32xf32> to vector<2x32xbf16>
    %76 = arith.index_cast %c1_i32 : i32 to index
    %c0_20 = arith.constant 0 : index
    %c0_21 = arith.constant 0 : index
    %77 = vector.load %arg4[%76, %c0_20, %c0_21] : memref<8x2x32xbf16, #tpu.memory_space<vmem>>, vector<1x2x32xbf16>
    %78 = vector.shape_cast %77 : vector<1x2x32xbf16> to vector<2x32xbf16>
    %79 = vector.shape_cast %75 : vector<2x32xbf16> to vector<1x2x32xbf16>
    tpu.vector_store %arg4[%76, %c0_20, %c0_21], %79 {strides = array<i32>} : memref<8x2x32xbf16, #tpu.memory_space<vmem>>, vector<1x2x32xbf16>,
    %c2_i32 = arith.constant 2 : i32
    %80 = arith.index_cast %c2_i32 : i32 to index
    %c0_22 = arith.constant 0 : index
    %c0_23 = arith.constant 0 : index
    %81 = vector.load %arg2[%80, %c0_22, %c0_23] : memref<8x2x128xbf16, #tpu.memory_space<vmem>>, vector<1x2x128xbf16>
    %82 = vector.shape_cast %81 : vector<1x2x128xbf16> to vector<2x128xbf16>
    %83 = arith.extf %82 : vector<2x128xbf16> to vector<2x128xf32>
    %84 = arith.truncf %74 : vector<2x32xf32> to vector<2x32xbf16>
    %cst_24 = arith.constant dense<0.000000e+00> : vector<2x128xf32>
    %85 = tpu.matmul %84, %3, %cst_24 {dimension_numbers = #tpu.dot_dimension_numbers<[1], [0], [0], [1], [0, 0, 1, 1], [], []>} : vector<2x32xbf16>, vector<32x128xbf16>, vector<2x128xf32> -> vector<2x128xf32>
    %86 = arith.addf %83, %85 : vector<2x128xf32>
    %87 = vector.extract_strided_slice %86 {offsets = [0, 0], sizes = [2, 32], strides = [1, 1]} : vector<2x128xf32> to vector<2x32xf32>
    %88 = arith.negf %87 : vector<2x32xf32>
    %89 = math.exp %88 : vector<2x32xf32>
    %cst_25 = arith.constant 1.000000e+00 : f32
    %90 = vector.broadcast %cst_25 : f32 to vector<2x32xf32>
    %91 = arith.addf %90, %89 : vector<2x32xf32>
    %92 = arith.divf %90, %91 : vector<2x32xf32>
    %93 = vector.extract_strided_slice %86 {offsets = [0, 32], sizes = [2, 32], strides = [1, 1]} : vector<2x128xf32> to vector<2x32xf32>
    %94 = arith.negf %93 : vector<2x32xf32>
    %95 = math.exp %94 : vector<2x32xf32>
    %cst_26 = arith.constant 1.000000e+00 : f32
    %96 = vector.broadcast %cst_26 : f32 to vector<2x32xf32>
    %97 = arith.addf %96, %95 : vector<2x32xf32>
    %98 = arith.divf %96, %97 : vector<2x32xf32>
    %99 = vector.extract_strided_slice %86 {offsets = [0, 64], sizes = [2, 32], strides = [1, 1]} : vector<2x128xf32> to vector<2x32xf32>
    %100 = math.tanh %99 : vector<2x32xf32>
    %101 = vector.extract_strided_slice %86 {offsets = [0, 96], sizes = [2, 32], strides = [1, 1]} : vector<2x128xf32> to vector<2x32xf32>
    %102 = arith.negf %101 : vector<2x32xf32>
    %103 = math.exp %102 : vector<2x32xf32>
    %cst_27 = arith.constant 1.000000e+00 : f32
    %104 = vector.broadcast %cst_27 : f32 to vector<2x32xf32>
    %105 = arith.addf %104, %103 : vector<2x32xf32>
    %106 = arith.divf %104, %105 : vector<2x32xf32>
    %107 = arith.mulf %98, %72 : vector<2x32xf32>
    %108 = arith.mulf %92, %100 : vector<2x32xf32>
    %109 = arith.addf %107, %108 : vector<2x32xf32>
    %110 = math.tanh %109 : vector<2x32xf32>
    %111 = arith.mulf %106, %110 : vector<2x32xf32>
    %112 = arith.truncf %111 : vector<2x32xf32> to vector<2x32xbf16>
    %113 = arith.index_cast %c2_i32 : i32 to index
    %c0_28 = arith.constant 0 : index
    %c0_29 = arith.constant 0 : index
    %114 = vector.load %arg4[%113, %c0_28, %c0_29] : memref<8x2x32xbf16, #tpu.memory_space<vmem>>, vector<1x2x32xbf16>
    %115 = vector.shape_cast %114 : vector<1x2x32xbf16> to vector<2x32xbf16>
    %116 = vector.shape_cast %112 : vector<2x32xbf16> to vector<1x2x32xbf16>
    tpu.vector_store %arg4[%113, %c0_28, %c0_29], %116 {strides = array<i32>} : memref<8x2x32xbf16, #tpu.memory_space<vmem>>, vector<1x2x32xbf16>,
    %c3_i32 = arith.constant 3 : i32
    %117 = arith.index_cast %c3_i32 : i32 to index
    %c0_30 = arith.constant 0 : index
    %c0_31 = arith.constant 0 : index
    %118 = vector.load %arg2[%117, %c0_30, %c0_31] : memref<8x2x128xbf16, #tpu.memory_space<vmem>>, vector<1x2x128xbf16>
    %119 = vector.shape_cast %118 : vector<1x2x128xbf16> to vector<2x128xbf16>
    %120 = arith.extf %119 : vector<2x128xbf16> to vector<2x128xf32>
    %121 = arith.truncf %111 : vector<2x32xf32> to vector<2x32xbf16>
    %cst_32 = arith.constant dense<0.000000e+00> : vector<2x128xf32>
    %122 = tpu.matmul %121, %3, %cst_32 {dimension_numbers = #tpu.dot_dimension_numbers<[1], [0], [0], [1], [0, 0, 1, 1], [], []>} : vector<2x32xbf16>, vector<32x128xbf16>, vector<2x128xf32> -> vector<2x128xf32>
    %123 = arith.addf %120, %122 : vector<2x128xf32>
    %124 = vector.extract_strided_slice %123 {offsets = [0, 0], sizes = [2, 32], strides = [1, 1]} : vector<2x128xf32> to vector<2x32xf32>
    %125 = arith.negf %124 : vector<2x32xf32>
    %126 = math.exp %125 : vector<2x32xf32>
    %cst_33 = arith.constant 1.000000e+00 : f32
    %127 = vector.broadcast %cst_33 : f32 to vector<2x32xf32>
    %128 = arith.addf %127, %126 : vector<2x32xf32>
    %129 = arith.divf %127, %128 : vector<2x32xf32>
    %130 = vector.extract_strided_slice %123 {offsets = [0, 32], sizes = [2, 32], strides = [1, 1]} : vector<2x128xf32> to vector<2x32xf32>
    %131 = arith.negf %130 : vector<2x32xf32>
    %132 = math.exp %131 : vector<2x32xf32>
    %cst_34 = arith.constant 1.000000e+00 : f32
    %133 = vector.broadcast %cst_34 : f32 to vector<2x32xf32>
    %134 = arith.addf %133, %132 : vector<2x32xf32>
    %135 = arith.divf %133, %134 : vector<2x32xf32>
    %136 = vector.extract_strided_slice %123 {offsets = [0, 64], sizes = [2, 32], strides = [1, 1]} : vector<2x128xf32> to vector<2x32xf32>
    %137 = math.tanh %136 : vector<2x32xf32>
    %138 = vector.extract_strided_slice %123 {offsets = [0, 96], sizes = [2, 32], strides = [1, 1]} : vector<2x128xf32> to vector<2x32xf32>
    %139 = arith.negf %138 : vector<2x32xf32>
    %140 = math.exp %139 : vector<2x32xf32>
    %cst_35 = arith.constant 1.000000e+00 : f32
    %141 = vector.broadcast %cst_35 : f32 to vector<2x32xf32>
    %142 = arith.addf %141, %140 : vector<2x32xf32>
    %143 = arith.divf %141, %142 : vector<2x32xf32>
    %144 = arith.mulf %135, %109 : vector<2x32xf32>
    %145 = arith.mulf %129, %137 : vector<2x32xf32>
    %146 = arith.addf %144, %145 : vector<2x32xf32>
    %147 = math.tanh %146 : vector<2x32xf32>
    %148 = arith.mulf %143, %147 : vector<2x32xf32>
    %149 = arith.truncf %148 : vector<2x32xf32> to vector<2x32xbf16>
    %150 = arith.index_cast %c3_i32 : i32 to index
    %c0_36 = arith.constant 0 : index
    %c0_37 = arith.constant 0 : index
    %151 = vector.load %arg4[%150, %c0_36, %c0_37] : memref<8x2x32xbf16, #tpu.memory_space<vmem>>, vector<1x2x32xbf16>
    %152 = vector.shape_cast %151 : vector<1x2x32xbf16> to vector<2x32xbf16>
    %153 = vector.shape_cast %149 : vector<2x32xbf16> to vector<1x2x32xbf16>
    tpu.vector_store %arg4[%150, %c0_36, %c0_37], %153 {strides = array<i32>} : memref<8x2x32xbf16, #tpu.memory_space<vmem>>, vector<1x2x32xbf16>,
    %c4_i32 = arith.constant 4 : i32
    %154 = arith.index_cast %c4_i32 : i32 to index
    %c0_38 = arith.constant 0 : index
    %c0_39 = arith.constant 0 : index
    %155 = vector.load %arg2[%154, %c0_38, %c0_39] : memref<8x2x128xbf16, #tpu.memory_space<vmem>>, vector<1x2x128xbf16>
    %156 = vector.shape_cast %155 : vector<1x2x128xbf16> to vector<2x128xbf16>
    %157 = arith.extf %156 : vector<2x128xbf16> to vector<2x128xf32>
    %158 = arith.truncf %148 : vector<2x32xf32> to vector<2x32xbf16>
    %cst_40 = arith.constant dense<0.000000e+00> : vector<2x128xf32>
    %159 = tpu.matmul %158, %3, %cst_40 {dimension_numbers = #tpu.dot_dimension_numbers<[1], [0], [0], [1], [0, 0, 1, 1], [], []>} : vector<2x32xbf16>, vector<32x128xbf16>, vector<2x128xf32> -> vector<2x128xf32>
    %160 = arith.addf %157, %159 : vector<2x128xf32>
    %161 = vector.extract_strided_slice %160 {offsets = [0, 0], sizes = [2, 32], strides = [1, 1]} : vector<2x128xf32> to vector<2x32xf32>
    %162 = arith.negf %161 : vector<2x32xf32>
    %163 = math.exp %162 : vector<2x32xf32>
    %cst_41 = arith.constant 1.000000e+00 : f32
    %164 = vector.broadcast %cst_41 : f32 to vector<2x32xf32>
    %165 = arith.addf %164, %163 : vector<2x32xf32>
    %166 = arith.divf %164, %165 : vector<2x32xf32>
    %167 = vector.extract_strided_slice %160 {offsets = [0, 32], sizes = [2, 32], strides = [1, 1]} : vector<2x128xf32> to vector<2x32xf32>
    %168 = arith.negf %167 : vector<2x32xf32>
    %169 = math.exp %168 : vector<2x32xf32>
    %cst_42 = arith.constant 1.000000e+00 : f32
    %170 = vector.broadcast %cst_42 : f32 to vector<2x32xf32>
    %171 = arith.addf %170, %169 : vector<2x32xf32>
    %172 = arith.divf %170, %171 : vector<2x32xf32>
    %173 = vector.extract_strided_slice %160 {offsets = [0, 64], sizes = [2, 32], strides = [1, 1]} : vector<2x128xf32> to vector<2x32xf32>
    %174 = math.tanh %173 : vector<2x32xf32>
    %175 = vector.extract_strided_slice %160 {offsets = [0, 96], sizes = [2, 32], strides = [1, 1]} : vector<2x128xf32> to vector<2x32xf32>
    %176 = arith.negf %175 : vector<2x32xf32>
    %177 = math.exp %176 : vector<2x32xf32>
    %cst_43 = arith.constant 1.000000e+00 : f32
    %178 = vector.broadcast %cst_43 : f32 to vector<2x32xf32>
    %179 = arith.addf %178, %177 : vector<2x32xf32>
    %180 = arith.divf %178, %179 : vector<2x32xf32>
    %181 = arith.mulf %172, %146 : vector<2x32xf32>
    %182 = arith.mulf %166, %174 : vector<2x32xf32>
    %183 = arith.addf %181, %182 : vector<2x32xf32>
    %184 = math.tanh %183 : vector<2x32xf32>
    %185 = arith.mulf %180, %184 : vector<2x32xf32>
    %186 = arith.truncf %185 : vector<2x32xf32> to vector<2x32xbf16>
    %187 = arith.index_cast %c4_i32 : i32 to index
    %c0_44 = arith.constant 0 : index
    %c0_45 = arith.constant 0 : index
    %188 = vector.load %arg4[%187, %c0_44, %c0_45] : memref<8x2x32xbf16, #tpu.memory_space<vmem>>, vector<1x2x32xbf16>
    %189 = vector.shape_cast %188 : vector<1x2x32xbf16> to vector<2x32xbf16>
    %190 = vector.shape_cast %186 : vector<2x32xbf16> to vector<1x2x32xbf16>
    tpu.vector_store %arg4[%187, %c0_44, %c0_45], %190 {strides = array<i32>} : memref<8x2x32xbf16, #tpu.memory_space<vmem>>, vector<1x2x32xbf16>,
    %c5_i32 = arith.constant 5 : i32
    %191 = arith.index_cast %c5_i32 : i32 to index
    %c0_46 = arith.constant 0 : index
    %c0_47 = arith.constant 0 : index
    %192 = vector.load %arg2[%191, %c0_46, %c0_47] : memref<8x2x128xbf16, #tpu.memory_space<vmem>>, vector<1x2x128xbf16>
    %193 = vector.shape_cast %192 : vector<1x2x128xbf16> to vector<2x128xbf16>
    %194 = arith.extf %193 : vector<2x128xbf16> to vector<2x128xf32>
    %195 = arith.truncf %185 : vector<2x32xf32> to vector<2x32xbf16>
    %cst_48 = arith.constant dense<0.000000e+00> : vector<2x128xf32>
    %196 = tpu.matmul %195, %3, %cst_48 {dimension_numbers = #tpu.dot_dimension_numbers<[1], [0], [0], [1], [0, 0, 1, 1], [], []>} : vector<2x32xbf16>, vector<32x128xbf16>, vector<2x128xf32> -> vector<2x128xf32>
    %197 = arith.addf %194, %196 : vector<2x128xf32>
    %198 = vector.extract_strided_slice %197 {offsets = [0, 0], sizes = [2, 32], strides = [1, 1]} : vector<2x128xf32> to vector<2x32xf32>
    %199 = arith.negf %198 : vector<2x32xf32>
    %200 = math.exp %199 : vector<2x32xf32>
    %cst_49 = arith.constant 1.000000e+00 : f32
    %201 = vector.broadcast %cst_49 : f32 to vector<2x32xf32>
    %202 = arith.addf %201, %200 : vector<2x32xf32>
    %203 = arith.divf %201, %202 : vector<2x32xf32>
    %204 = vector.extract_strided_slice %197 {offsets = [0, 32], sizes = [2, 32], strides = [1, 1]} : vector<2x128xf32> to vector<2x32xf32>
    %205 = arith.negf %204 : vector<2x32xf32>
    %206 = math.exp %205 : vector<2x32xf32>
    %cst_50 = arith.constant 1.000000e+00 : f32
    %207 = vector.broadcast %cst_50 : f32 to vector<2x32xf32>
    %208 = arith.addf %207, %206 : vector<2x32xf32>
    %209 = arith.divf %207, %208 : vector<2x32xf32>
    %210 = vector.extract_strided_slice %197 {offsets = [0, 64], sizes = [2, 32], strides = [1, 1]} : vector<2x128xf32> to vector<2x32xf32>
    %211 = math.tanh %210 : vector<2x32xf32>
    %212 = vector.extract_strided_slice %197 {offsets = [0, 96], sizes = [2, 32], strides = [1, 1]} : vector<2x128xf32> to vector<2x32xf32>
    %213 = arith.negf %212 : vector<2x32xf32>
    %214 = math.exp %213 : vector<2x32xf32>
    %cst_51 = arith.constant 1.000000e+00 : f32
    %215 = vector.broadcast %cst_51 : f32 to vector<2x32xf32>
    %216 = arith.addf %215, %214 : vector<2x32xf32>
    %217 = arith.divf %215, %216 : vector<2x32xf32>
    %218 = arith.mulf %209, %183 : vector<2x32xf32>
    %219 = arith.mulf %203, %211 : vector<2x32xf32>
    %220 = arith.addf %218, %219 : vector<2x32xf32>
    %221 = math.tanh %220 : vector<2x32xf32>
    %222 = arith.mulf %217, %221 : vector<2x32xf32>
    %223 = arith.truncf %222 : vector<2x32xf32> to vector<2x32xbf16>
    %224 = arith.index_cast %c5_i32 : i32 to index
    %c0_52 = arith.constant 0 : index
    %c0_53 = arith.constant 0 : index
    %225 = vector.load %arg4[%224, %c0_52, %c0_53] : memref<8x2x32xbf16, #tpu.memory_space<vmem>>, vector<1x2x32xbf16>
    %226 = vector.shape_cast %225 : vector<1x2x32xbf16> to vector<2x32xbf16>
    %227 = vector.shape_cast %223 : vector<2x32xbf16> to vector<1x2x32xbf16>
    tpu.vector_store %arg4[%224, %c0_52, %c0_53], %227 {strides = array<i32>} : memref<8x2x32xbf16, #tpu.memory_space<vmem>>, vector<1x2x32xbf16>,
    %c6_i32 = arith.constant 6 : i32
    %228 = arith.index_cast %c6_i32 : i32 to index
    %c0_54 = arith.constant 0 : index
    %c0_55 = arith.constant 0 : index
    %229 = vector.load %arg2[%228, %c0_54, %c0_55] : memref<8x2x128xbf16, #tpu.memory_space<vmem>>, vector<1x2x128xbf16>
    %230 = vector.shape_cast %229 : vector<1x2x128xbf16> to vector<2x128xbf16>
    %231 = arith.extf %230 : vector<2x128xbf16> to vector<2x128xf32>
    %232 = arith.truncf %222 : vector<2x32xf32> to vector<2x32xbf16>
    %cst_56 = arith.constant dense<0.000000e+00> : vector<2x128xf32>
    %233 = tpu.matmul %232, %3, %cst_56 {dimension_numbers = #tpu.dot_dimension_numbers<[1], [0], [0], [1], [0, 0, 1, 1], [], []>} : vector<2x32xbf16>, vector<32x128xbf16>, vector<2x128xf32> -> vector<2x128xf32>
    %234 = arith.addf %231, %233 : vector<2x128xf32>
    %235 = vector.extract_strided_slice %234 {offsets = [0, 0], sizes = [2, 32], strides = [1, 1]} : vector<2x128xf32> to vector<2x32xf32>
    %236 = arith.negf %235 : vector<2x32xf32>
    %237 = math.exp %236 : vector<2x32xf32>
    %cst_57 = arith.constant 1.000000e+00 : f32
    %238 = vector.broadcast %cst_57 : f32 to vector<2x32xf32>
    %239 = arith.addf %238, %237 : vector<2x32xf32>
    %240 = arith.divf %238, %239 : vector<2x32xf32>
    %241 = vector.extract_strided_slice %234 {offsets = [0, 32], sizes = [2, 32], strides = [1, 1]} : vector<2x128xf32> to vector<2x32xf32>
    %242 = arith.negf %241 : vector<2x32xf32>
    %243 = math.exp %242 : vector<2x32xf32>
    %cst_58 = arith.constant 1.000000e+00 : f32
    %244 = vector.broadcast %cst_58 : f32 to vector<2x32xf32>
    %245 = arith.addf %244, %243 : vector<2x32xf32>
    %246 = arith.divf %244, %245 : vector<2x32xf32>
    %247 = vector.extract_strided_slice %234 {offsets = [0, 64], sizes = [2, 32], strides = [1, 1]} : vector<2x128xf32> to vector<2x32xf32>
    %248 = math.tanh %247 : vector<2x32xf32>
    %249 = vector.extract_strided_slice %234 {offsets = [0, 96], sizes = [2, 32], strides = [1, 1]} : vector<2x128xf32> to vector<2x32xf32>
    %250 = arith.negf %249 : vector<2x32xf32>
    %251 = math.exp %250 : vector<2x32xf32>
    %cst_59 = arith.constant 1.000000e+00 : f32
    %252 = vector.broadcast %cst_59 : f32 to vector<2x32xf32>
    %253 = arith.addf %252, %251 : vector<2x32xf32>
    %254 = arith.divf %252, %253 : vector<2x32xf32>
    %255 = arith.mulf %246, %220 : vector<2x32xf32>
    %256 = arith.mulf %240, %248 : vector<2x32xf32>
    %257 = arith.addf %255, %256 : vector<2x32xf32>
    %258 = math.tanh %257 : vector<2x32xf32>
    %259 = arith.mulf %254, %258 : vector<2x32xf32>
    %260 = arith.truncf %259 : vector<2x32xf32> to vector<2x32xbf16>
    %261 = arith.index_cast %c6_i32 : i32 to index
    %c0_60 = arith.constant 0 : index
    %c0_61 = arith.constant 0 : index
    %262 = vector.load %arg4[%261, %c0_60, %c0_61] : memref<8x2x32xbf16, #tpu.memory_space<vmem>>, vector<1x2x32xbf16>
    %263 = vector.shape_cast %262 : vector<1x2x32xbf16> to vector<2x32xbf16>
    %264 = vector.shape_cast %260 : vector<2x32xbf16> to vector<1x2x32xbf16>
    tpu.vector_store %arg4[%261, %c0_60, %c0_61], %264 {strides = array<i32>} : memref<8x2x32xbf16, #tpu.memory_space<vmem>>, vector<1x2x32xbf16>,
    %c7_i32 = arith.constant 7 : i32
    %265 = arith.index_cast %c7_i32 : i32 to index
    %c0_62 = arith.constant 0 : index
    %c0_63 = arith.constant 0 : index
    %266 = vector.load %arg2[%265, %c0_62, %c0_63] : memref<8x2x128xbf16, #tpu.memory_space<vmem>>, vector<1x2x128xbf16>
    %267 = vector.shape_cast %266 : vector<1x2x128xbf16> to vector<2x128xbf16>
    %268 = arith.extf %267 : vector<2x128xbf16> to vector<2x128xf32>
    %269 = arith.truncf %259 : vector<2x32xf32> to vector<2x32xbf16>
    %cst_64 = arith.constant dense<0.000000e+00> : vector<2x128xf32>
    %270 = tpu.matmul %269, %3, %cst_64 {dimension_numbers = #tpu.dot_dimension_numbers<[1], [0], [0], [1], [0, 0, 1, 1], [], []>} : vector<2x32xbf16>, vector<32x128xbf16>, vector<2x128xf32> -> vector<2x128xf32>
    %271 = arith.addf %268, %270 : vector<2x128xf32>
    %272 = vector.extract_strided_slice %271 {offsets = [0, 0], sizes = [2, 32], strides = [1, 1]} : vector<2x128xf32> to vector<2x32xf32>
    %273 = arith.negf %272 : vector<2x32xf32>
    %274 = math.exp %273 : vector<2x32xf32>
    %cst_65 = arith.constant 1.000000e+00 : f32
    %275 = vector.broadcast %cst_65 : f32 to vector<2x32xf32>
    %276 = arith.addf %275, %274 : vector<2x32xf32>
    %277 = arith.divf %275, %276 : vector<2x32xf32>
    %278 = vector.extract_strided_slice %271 {offsets = [0, 32], sizes = [2, 32], strides = [1, 1]} : vector<2x128xf32> to vector<2x32xf32>
    %279 = arith.negf %278 : vector<2x32xf32>
    %280 = math.exp %279 : vector<2x32xf32>
    %cst_66 = arith.constant 1.000000e+00 : f32
    %281 = vector.broadcast %cst_66 : f32 to vector<2x32xf32>
    %282 = arith.addf %281, %280 : vector<2x32xf32>
    %283 = arith.divf %281, %282 : vector<2x32xf32>
    %284 = vector.extract_strided_slice %271 {offsets = [0, 64], sizes = [2, 32], strides = [1, 1]} : vector<2x128xf32> to vector<2x32xf32>
    %285 = math.tanh %284 : vector<2x32xf32>
    %286 = vector.extract_strided_slice %271 {offsets = [0, 96], sizes = [2, 32], strides = [1, 1]} : vector<2x128xf32> to vector<2x32xf32>
    %287 = arith.negf %286 : vector<2x32xf32>
    %288 = math.exp %287 : vector<2x32xf32>
    %cst_67 = arith.constant 1.000000e+00 : f32
    %289 = vector.broadcast %cst_67 : f32 to vector<2x32xf32>
    %290 = arith.addf %289, %288 : vector<2x32xf32>
    %291 = arith.divf %289, %290 : vector<2x32xf32>
    %292 = arith.mulf %283, %257 : vector<2x32xf32>
    %293 = arith.mulf %277, %285 : vector<2x32xf32>
    %294 = arith.addf %292, %293 : vector<2x32xf32>
    %295 = math.tanh %294 : vector<2x32xf32>
    %296 = arith.mulf %291, %295 : vector<2x32xf32>
    %297 = arith.truncf %296 : vector<2x32xf32> to vector<2x32xbf16>
    %298 = arith.index_cast %c7_i32 : i32 to index
    %c0_68 = arith.constant 0 : index
    %c0_69 = arith.constant 0 : index
    %299 = vector.load %arg4[%298, %c0_68, %c0_69] : memref<8x2x32xbf16, #tpu.memory_space<vmem>>, vector<1x2x32xbf16>
    %300 = vector.shape_cast %299 : vector<1x2x32xbf16> to vector<2x32xbf16>
    %301 = vector.shape_cast %297 : vector<2x32xbf16> to vector<1x2x32xbf16>
    tpu.vector_store %arg4[%298, %c0_68, %c0_69], %301 {strides = array<i32>} : memref<8x2x32xbf16, #tpu.memory_space<vmem>>, vector<1x2x32xbf16>,
    %c8_i32 = arith.constant 8 : i32
    %c0_70 = arith.constant 0 : index
    %c0_71 = arith.constant 0 : index
    %302 = vector.load %arg5[%c0_70, %c0_71] : memref<2x32xf32, #tpu.memory_space<vmem>>, vector<2x32xf32>
    tpu.vector_store %arg5[%c0_70, %c0_71], %296 {strides = array<i32>} : memref<2x32xf32, #tpu.memory_space<vmem>>, vector<2x32xf32>,
    %c0_72 = arith.constant 0 : index
    %c0_73 = arith.constant 0 : index
    %303 = vector.load %arg6[%c0_72, %c0_73] : memref<2x32xf32, #tpu.memory_space<vmem>>, vector<2x32xf32>
    tpu.vector_store %arg6[%c0_72, %c0_73], %294 {strides = array<i32>} : memref<2x32xf32, #tpu.memory_space<vmem>>, vector<2x32xf32>,
    return
  }
  func.func @transform_0(%arg0: i32, %arg1: i32) -> (i32, i32, i32) {
    %c0_i32 = arith.constant 0 : i32
    %c0_i32_0 = arith.constant 0 : i32
    return %arg1, %arg0, %c0_i32 : i32, i32, i32
  }
  func.func @transform_1(%arg0: i32, %arg1: i32) -> (i32, i32) {
    %c0_i32 = arith.constant 0 : i32
    %c0_i32_0 = arith.constant 0 : i32
    %c0_i32_1 = arith.constant 0 : i32
    return %c0_i32, %c0_i32_0 : i32, i32
  }
  func.func @transform_2(%arg0: i32, %arg1: i32) -> (i32, i32, i32) {
    %c0_i32 = arith.constant 0 : i32
    %c0_i32_0 = arith.constant 0 : i32
    return %arg1, %arg0, %c0_i32 : i32, i32, i32
  }
}

</mosaic_0001>

<bundles_post_ra>
// kernel: lstm_with_attention_forward.3
= control target key start
LH: loop header
LB: loop body
LE: loop exit
PB: predicated region body
PF: predicated region fallthrough
CT: control target
= control target key end

     0   :  { %8 = vsyncpa [#allocation3], 0  ;;  %s446_s0 = inlined_call_operand.hbm [shape: f32[8,2,16], index: 0, kind: input, shape index: {}]   ;;  %s447_s1 = inlined_call_operand.hbm [shape: bf16[16,128], index: 1, kind: input, shape index: {}]   ;;  %s448_s2 = inlined_call_operand.hbm [shape: f32[1,128], index: 2, kind: input, shape index: {}]   ;;  %s449_s3 = inlined_call_operand.hbm [shape: bf16[8,2,128], index: 3, kind: output, shape index: {}]  }
   0x1   :  { %9 = vsyncpa [#allocation6], 0 }
   0x2   :  { %10 = vsyncpa [#allocation4], 0  ;;  %s365_s12 = smov [#allocation5]   ;;  %s271_s16 = scalar_lea.hbm %s447_s1, 128 }
   0x3   :  { %s28_s13 = sshll.u32 %s365_s12, 4  ;;  %p272_p0 = scmp.ne.s32.totalorder %s447_s1, %s271_s16  ;;  %s29_s13 = int_to_ptr.vmem [resolvable:$true] %s28_s13 }
   0x4   :  { %p275_p1 = scmp.lt.u32.totalorder %s271_s16, %s447_s1 }
   0x6   :  { %p277_p2 = pnand %p275_p1, %p272_p0 }
   0x8   :  { %280 = shalt.err (!%p277_p2)
}
   0x9   :  { %s281_s21 = scalar_lea.vmem %s29_s13, 128  ;;  %p286_p4 = scmp.lt.s32.totalorder %s29_s13, %s29_s13 }
   0xa   :  { %p282_p3 = scmp.ne.s32.totalorder %s29_s13, %s281_s21  ;;  %p287_p5 = scmp.lt.s32.totalorder %s281_s21, %s281_s21 }
   0xc   :  { %p288_p6 = por %p287_p5, %p286_p4 }
   0xe   :  { %p289_p7 = pnand %p288_p6, %p282_p3 }
  0x10   :  { %292 = shalt.err (!%p289_p7)
}
  0x11   :  { %s366_s22 = smov 64   ;;  %s367_s23 = smov 4  }
  0x12   :  { %34 = dma.hbm_to_vmem [thread:$0]  %s447_s1, 128, %s29_s13, [#allocation6], %s366_s22, %s366_s22, %s367_s23  }
  0x13   :  { %s368_s26 = smov [#allocation2]   ;;  %s293_s30 = scalar_lea.hbm %s446_s0, 256 }
  0x14   :  { %s16_s27 = sshll.u32 %s368_s26, 4  ;;  %p294_p8 = scmp.ne.s32.totalorder %s446_s0, %s293_s30  ;;  %s17_s27 = int_to_ptr.vmem [resolvable:$true] %s16_s27 }
  0x15   :  { %p297_p9 = scmp.lt.u32.totalorder %s293_s30, %s446_s0 }
  0x17   :  { %p299_p10 = pnand %p297_p9, %p294_p8 }
  0x19   :  { %302 = shalt.err (!%p299_p10)
}
  0x1a   :  { %s303_s8 = scalar_lea.vmem %s17_s27, 256  ;;  %p308_p12 = scmp.lt.s32.totalorder %s17_s27, %s17_s27 }
  0x1b   :  { %p304_p11 = scmp.ne.s32.totalorder %s17_s27, %s303_s8  ;;  %p309_p13 = scmp.lt.s32.totalorder %s303_s8, %s303_s8 }
  0x1d   :  { %p310_p0 = por %p309_p13, %p308_p12 }
  0x1f   :  { %p311_p1 = pnand %p310_p0, %p304_p11 }
  0x21   :  { %314 = shalt.err (!%p311_p1)
}
  0x22   :  { %s369_s1 = smov 32   ;;  %s370_s9 = smov 2  }
  0x23   :  { %22 = dma.hbm_to_vmem [thread:$0]  %s446_s0, 256, %s17_s27, [#allocation3], %s369_s1, %s369_s1, %s370_s9  }
  0x24   :  { %s371_s12 = smov [#allocation7]   ;;  %s315_s16 = scalar_lea.hbm %s448_s2, 16 }
  0x25   :  { %s41_s13 = sshll.u32 %s371_s12, 4  ;;  %p316_p2 = scmp.ne.s32.totalorder %s448_s2, %s315_s16  ;;  %s42_s13 = int_to_ptr.vmem [resolvable:$true] %s41_s13 }
  0x26   :  { %p319_p3 = scmp.lt.u32.totalorder %s315_s16, %s448_s2 }
  0x28   :  { %p321_p4 = pnand %p319_p3, %p316_p2 }
  0x2a   :  { %324 = shalt.err (!%p321_p4)
}
  0x2b   :  { %s325_s21 = scalar_lea.vmem %s42_s13, 16  ;;  %s329_s0 = scalar_lea.vmem %s42_s13, 32 }
  0x2c   :  { %p326_p5 = scmp.ne.s32.totalorder %s42_s13, %s325_s21  ;;  %p330_p6 = scmp.lt.s32.totalorder %s42_s13, %s42_s13 }
  0x2d   :  { %p331_p7 = scmp.lt.s32.totalorder %s329_s0, %s325_s21 }
  0x2f   :  { %p332_p8 = por %p331_p7, %p330_p6 }
  0x31   :  { %p333_p9 = pnand %p332_p8, %p326_p5 }
  0x33   :  { %336 = shalt.err (!%p333_p9)
}
  0x34   :  { %44 = dma.hbm_to_vmem [thread:$0]  %s448_s2, 16, %s42_s13, [#allocation6]  }
  0x35   :  { %359 = dma.done.wait [#allocation3], 256  }
  0x36   :  { %360 = vsyncadd [#allocation3], 4294967040 }
  0x37   :  { %361 = dma.done.wait [#allocation6], 144  }
  0x38   :  { %362 = vsyncadd [#allocation6], 4294967152  ;;  %v76_v0 = vlaneseq  ;;  %v372_v1 = vmov 0.0   ;;  %vm373_vm0 = vmmov 0   ;;  %v374_v2 = vmov 1983009808  }
  0x39   :  { %251 = vmatprep.subr.bf16.mxu0 %v372_v1  ;;  %253 = vmatprep.mubr.msk.bf16.mxu0 %vm373_vm0, %v372_v1  ;;  %v74_v3 = vunpack.c.l.s4 %v374_v2  ;;  %v270_v6 = vld [vmem:[#allocation5] sm:$0xff]   ;;  %v55_v8 = vld [vmem:[#allocation2] sm:$0x3]  ;;  %v56_v9 = vld [vmem:[#allocation2 + $0x2] sm:$0x3]  ;;  %vm123_vm1 = vcmask 130048  }
  0x3a   :  { %v77_v5 = vshrl.u32 %v76_v0, 7  ;;  %v57_v10 = vld [vmem:[#allocation2 + $0x4] sm:$0x3]  ;;  %252 = vmatpush3.bf16.msra.mxu0 %v270_v6  ;;  %v58_v11 = vld [vmem:[#allocation2 + $0x6] sm:$0x3]  ;;  %v71_v14 = vcombine.low %v55_v8, %v56_v9  ;;  %s375_s2 = smov [#allocation8]  }
  0x3b   :  { %v75_v4 = vunpack.c.0.s8 %v74_v3  ;;  %v59_v12 = vld [vmem:[#allocation2 + $0x8] sm:$0x3]  ;;  %v60_v13 = vld [vmem:[#allocation2 + $0xa] sm:$0x3]  ;;  %v61_v15 = vld [vmem:[#allocation2 + $0xc] sm:$0x3]  ;;  %v72_v17 = vcombine.low %v57_v10, %v58_v11 }
  0x3c   :  { %v62_v16 = vld [vmem:[#allocation2 + $0xe] sm:$0x3]  ;;  %v88_v18 = vcombine.low %v59_v12, %v60_v13  ;;  %v246_v27 = vld [vmem:[#allocation7] ss:$0 sm:$0xff]  ;;  %s233_s24 = sshll.u32 %s375_s2, 4  ;;  %s234_s24 = int_to_ptr.vmem [resolvable:$true] %s233_s24 }
  0x3d   :  { %v78_v7 = vsub.s32 %v75_v4, %v77_v5  ;;  %v89_v20 = vcombine.low %v61_v15, %v62_v16  ;;  %s337_s25 = scalar_lea.vmem %s234_s24, 128  ;;  %p342_p11 = scmp.lt.s32.totalorder %s234_s24, %s234_s24 }
  0x3e   :  { %p338_p10 = scmp.ne.s32.totalorder %s234_s24, %s337_s25  ;;  %p343_p12 = scmp.lt.s32.totalorder %s337_s25, %s337_s25 }
  0x3f   :  { %v79_v19 = vrot.slane %v71_v14, %v78_v7  ;;  %v86_v21 = vrot.slane %v72_v17, %v78_v7  ;;  %v96_v22 = vrot.slane %v88_v18, %v78_v7  ;;  %v103_v23 = vrot.slane %v89_v20, %v78_v7 }
  0x40   :  { %p344_p13 = por %p343_p12, %p342_p11 }
  0x41   :  { %v87_v24 = vcombine.low %v79_v19, %v86_v21  ;;  %v104_v25 = vcombine.low %v96_v22, %v103_v23 }
  0x42   :  { %p345_p0 = pnand %p344_p13, %p338_p10 }
  0x43   :  { %v107_v26 = vpack.c.bf16 %v104_v25, %v87_v24 }
  0x45   :  { %254 = vmatmul.mubr.msk.bf16.vlgmr.msra.gmra.mrb[0].mxu0 %vm123_vm1, %v107_v26 }
 0x118   :  { %v161_v28 = vpop.f32.mrb[0].mxu0 }
 0x119   :  { %v162_v29 = vadd.f32 %v246_v27, %v161_v28  ;;  %v255_v30 = vpop.f32.mrb[1].mxu0 }
 0x11a   :  { %v164_v31 = vpop.f32.mrb[2].mxu0 }
 0x11b   :  { %v170_v32 = vcombine.high %v162_v29, %v162_v29  ;;  %v177_v33 = vrot.slane %v162_v29, %v78_v7  ;;  %v165_v34 = vadd.f32 %v246_v27, %v164_v31  ;;  %v256_v35 = vpop.f32.mrb[3].mxu0 }
 0x11d   :  { %v184_v36 = vrot.slane %v170_v32, %v78_v7  ;;  %v185_v37 = vcombine.high %v177_v33, %v177_v33  ;;  %v212_v38 = vpack.c.bf16 %v177_v33, %v177_v33  ;;  %v187_v39 = vcombine.high %v165_v34, %v165_v34 }
 0x11e   :  { %v194_v40 = vrot.slane %v165_v34, %v78_v7 }
 0x11f   :  { %v186_v41 = vcombine.high %v184_v36, %v184_v36  ;;  %v213_v42 = vpack.c.bf16 %v185_v37, %v185_v37  ;;  %v214_v43 = vpack.c.bf16 %v184_v36, %v184_v36  ;;  %220 = vst [vmem:[#allocation8] sm:$0x1] %v212_v38  ;;  %v201_v44 = vrot.slane %v187_v39, %v78_v7 }
 0x120   :  { %v202_v45 = vcombine.high %v194_v40, %v194_v40  ;;  %v216_v46 = vpack.c.bf16 %v194_v40, %v194_v40 }
 0x121   :  { %v215_v47 = vpack.c.bf16 %v186_v41, %v186_v41  ;;  %221 = vst [vmem:[#allocation8 + $0x1] sm:$0x1] %v213_v42  ;;  %222 = vst [vmem:[#allocation8 + $0x2] sm:$0x1] %v214_v43  ;;  %v203_v48 = vcombine.high %v201_v44, %v201_v44  ;;  %v218_v49 = vpack.c.bf16 %v201_v44, %v201_v44 }
 0x122   :  { %v217_v50 = vpack.c.bf16 %v202_v45, %v202_v45  ;;  %224 = vst [vmem:[#allocation8 + $0x4] sm:$0x1] %v216_v46 }
 0x123   :  { %223 = vst [vmem:[#allocation8 + $0x3] sm:$0x1] %v215_v47  ;;  %v219_v51 = vpack.c.bf16 %v203_v48, %v203_v48  ;;  %226 = vst [vmem:[#allocation8 + $0x6] sm:$0x1] %v218_v49 }
 0x124   :  { %225 = vst [vmem:[#allocation8 + $0x5] sm:$0x1] %v217_v50 }
 0x125   :  { %227 = vst [vmem:[#allocation8 + $0x7] sm:$0x1] %v219_v51 }
 0x126   :  { %348 = shalt.err (!%p345_p0)
}
 0x127   :  { %s349_s28 = scalar_lea.hbm %s449_s3, 128 }
 0x128   :  { %p350_p1 = scmp.ne.s32.totalorder %s449_s3, %s349_s28  ;;  %p353_p2 = scmp.lt.u32.totalorder %s349_s28, %s449_s3 }
 0x12a   :  { %p355_p3 = pnand %p353_p2, %p350_p1 }
 0x12c   :  { %358 = shalt.err (!%p355_p3)
}
 0x12d   :  { %s376_s6 = smov 16   ;;  %s377_s7 = smov 1  }
 0x12e   :  { %239 = dma.vmem_to_hbm [thread:$0]  %s234_s24, 128, %s449_s3, [#allocation4], %s376_s6, %s376_s6, %s377_s7  }
 0x12f   :  { %363 = dma.done.wait [#allocation4], 128  }
 0x130   :  { %364 = vsyncadd [#allocation4], 4294967168 }
 0x131   :  { %243 = vsyncpa [#allocation3], 1 }
 0x132   :  { %244 = vsyncpa [#allocation6], 1 }
 0x133   :  { %245 = vsyncpa [#allocation4], 1 }

// kernel: lstm_with_attention_forward.5
= control target key start
LH: loop header
LB: loop body
LE: loop exit
PB: predicated region body
PF: predicated region fallthrough
CT: control target
= control target key end

     0   :  { %13 = vsyncpa [#allocation3], 0  ;;  %s1519_s0 = inlined_call_operand.hbm [shape: bf16[8,2,32], index: 0, kind: input, shape index: {}]   ;;  %s1520_s1 = inlined_call_operand.hbm [shape: bf16[32,32], index: 1, kind: input, shape index: {}]   ;;  %s1521_s2 = inlined_call_operand.hbm [shape: f32[1,32], index: 2, kind: input, shape index: {}]   ;;  %s1522_s3 = inlined_call_operand.hbm [shape: bf16[32,4], index: 3, kind: input, shape index: {}]   ;;  %s1523_s4 = inlined_call_operand.hbm [shape: bf16[32,4], index: 4, kind: input, shape index: {}]   ;;  %s1524_s5 = inlined_call_operand.hbm [shape: f32[1,4], index: 5, kind: input, shape index: {}]   ;;  %s1525_s6 = inlined_call_operand.hbm [shape: f32[2,4], index: 6, kind: output, shape index: {0}]   ;;  %s1526_s7 = inlined_call_operand.hbm [shape: f32[2,64], index: 7, kind: output, shape index: {1}]  }
   0x1   :  { %14 = vsyncpa [#allocation6], 0 }
   0x2   :  { %15 = vsyncpa [#allocation9], 0 }
   0x3   :  { %16 = vsyncpa [#allocation12], 0 }
   0x4   :  { %17 = vsyncpa [#allocation4], 0 }
   0x5   :  { %18 = vsyncpa [#allocation15], 0  ;;  %s1222_s24 = smov [#allocation5]   ;;  %s1034_s28 = scalar_lea.hbm %s1520_s1, 256 }
   0x6   :  { %s36_s25 = sshll.u32 %s1222_s24, 4  ;;  %p1035_p0 = scmp.ne.s32.totalorder %s1520_s1, %s1034_s28  ;;  %s37_s25 = int_to_ptr.vmem [resolvable:$true] %s36_s25 }
   0x7   :  { %p1038_p1 = scmp.lt.u32.totalorder %s1034_s28, %s1520_s1 }
   0x9   :  { %p1040_p2 = pnand %p1038_p1, %p1035_p0 }
   0xb   :  { %1043 = shalt.err (!%p1040_p2)
}
   0xc   :  { %s1044_s10 = scalar_lea.vmem %s37_s25, 256  ;;  %p1049_p4 = scmp.lt.s32.totalorder %s37_s25, %s37_s25 }
   0xd   :  { %p1045_p3 = scmp.ne.s32.totalorder %s37_s25, %s1044_s10  ;;  %p1050_p5 = scmp.lt.s32.totalorder %s1044_s10, %s1044_s10 }
   0xf   :  { %p1051_p6 = por %p1050_p5, %p1049_p4 }
  0x11   :  { %p1052_p7 = pnand %p1051_p6, %p1045_p3 }
  0x13   :  { %1055 = shalt.err (!%p1052_p7)
}
  0x14   :  { %s1223_s11 = smov 64   ;;  %s1224_s12 = smov 4  }
  0x15   :  { %42 = dma.hbm_to_vmem [thread:$0]  %s1520_s1, 256, %s37_s25, [#allocation6], %s1223_s11, %s1223_s11, %s1224_s12  }
  0x16   :  { %s1225_s15 = smov [#allocation8]   ;;  %s1226_s17 = smov [#allocation2]  }
  0x17   :  { %s58_s16 = sshll.u32 %s1225_s15, 4  ;;  %s24_s18 = sshll.u32 %s1226_s17, 4  ;;  %s59_s16 = int_to_ptr.vmem [resolvable:$true] %s58_s16  ;;  %s25_s18 = int_to_ptr.vmem [resolvable:$true] %s24_s18 }
  0x18   :  { %s1056_s21 = scalar_lea.hbm %s1522_s3, 256 }
  0x19   :  { %p1057_p8 = scmp.ne.s32.totalorder %s1522_s3, %s1056_s21  ;;  %p1060_p9 = scmp.lt.u32.totalorder %s1056_s21, %s1522_s3 }
  0x1b   :  { %p1062_p10 = pnand %p1060_p9, %p1057_p8 }
  0x1d   :  { %1065 = shalt.err (!%p1062_p10)
}
  0x1e   :  { %s1066_s1 = scalar_lea.vmem %s59_s16, 256  ;;  %p1071_p12 = scmp.lt.s32.totalorder %s59_s16, %s59_s16 }
  0x1f   :  { %p1067_p11 = scmp.ne.s32.totalorder %s59_s16, %s1066_s1  ;;  %p1072_p13 = scmp.lt.s32.totalorder %s1066_s1, %s1066_s1 }
  0x21   :  { %p1073_p0 = por %p1072_p13, %p1071_p12 }
  0x23   :  { %p1074_p1 = pnand %p1073_p0, %p1067_p11 }
  0x25   :  { %1077 = shalt.err (!%p1074_p1)
}
  0x26   :  { %64 = dma.hbm_to_vmem [thread:$0]  %s1522_s3, 256, %s59_s16, [#allocation9], %s1223_s11, %s1223_s11, %s1224_s12  }
  0x27   :  { %s1078_s30 = scalar_lea.hbm %s1519_s0, 128 }
  0x28   :  { %p1079_p2 = scmp.ne.s32.totalorder %s1519_s0, %s1078_s30  ;;  %p1082_p3 = scmp.lt.u32.totalorder %s1078_s30, %s1519_s0 }
  0x2a   :  { %p1084_p4 = pnand %p1082_p3, %p1079_p2 }
  0x2c   :  { %1087 = shalt.err (!%p1084_p4)
}
  0x2d   :  { %s1088_s14 = scalar_lea.vmem %s25_s18, 128  ;;  %p1093_p6 = scmp.lt.s32.totalorder %s25_s18, %s25_s18 }
  0x2e   :  { %p1089_p5 = scmp.ne.s32.totalorder %s25_s18, %s1088_s14  ;;  %p1094_p7 = scmp.lt.s32.totalorder %s1088_s14, %s1088_s14 }
  0x30   :  { %p1095_p8 = por %p1094_p7, %p1093_p6 }
  0x32   :  { %p1096_p9 = pnand %p1095_p8, %p1089_p5 }
  0x34   :  { %1099 = shalt.err (!%p1096_p9)
}
  0x35   :  { %s1227_s3 = smov 16   ;;  %s1228_s15 = smov 1  }
  0x36   :  { %30 = dma.hbm_to_vmem [thread:$0]  %s1519_s0, 128, %s25_s18, [#allocation3], %s1227_s3, %s1227_s3, %s1228_s15  }
  0x37   :  { %s1229_s19 = smov [#allocation7]   ;;  %s1230_s21 = smov [#allocation10]  }
  0x38   :  { %s49_s20 = sshll.u32 %s1229_s19, 4  ;;  %s70_s22 = sshll.u32 %s1230_s21, 4  ;;  %s50_s20 = int_to_ptr.vmem [resolvable:$true] %s49_s20  ;;  %s71_s22 = int_to_ptr.vmem [resolvable:$true] %s70_s22 }
  0x39   :  { %s1100_s26 = scalar_lea.hbm %s1521_s2, 16 }
  0x3a   :  { %p1101_p10 = scmp.ne.s32.totalorder %s1521_s2, %s1100_s26  ;;  %p1104_p11 = scmp.lt.u32.totalorder %s1100_s26, %s1521_s2 }
  0x3c   :  { %p1106_p12 = pnand %p1104_p11, %p1101_p10 }
  0x3e   :  { %1109 = shalt.err (!%p1106_p12)
}
  0x3f   :  { %s1110_s0 = scalar_lea.vmem %s50_s20, 16  ;;  %s1114_s18 = scalar_lea.vmem %s50_s20, 32 }
  0x40   :  { %p1111_p13 = scmp.ne.s32.totalorder %s50_s20, %s1110_s0  ;;  %p1115_p0 = scmp.lt.s32.totalorder %s50_s20, %s50_s20 }
  0x41   :  { %p1116_p1 = scmp.lt.s32.totalorder %s1114_s18, %s1110_s0 }
  0x43   :  { %p1117_p2 = por %p1116_p1, %p1115_p0 }
  0x45   :  { %p1118_p3 = pnand %p1117_p2, %p1111_p13 }
  0x47   :  { %1121 = shalt.err (!%p1118_p3)
}
  0x48   :  { %52 = dma.hbm_to_vmem [thread:$0]  %s1521_s2, 16, %s50_s20, [#allocation6]  }
  0x49   :  { %s1122_s10 = scalar_lea.hbm %s1523_s4, 256 }
  0x4a   :  { %p1123_p4 = scmp.ne.s32.totalorder %s1523_s4, %s1122_s10  ;;  %p1126_p5 = scmp.lt.u32.totalorder %s1122_s10, %s1523_s4 }
  0x4c   :  { %p1128_p6 = pnand %p1126_p5, %p1123_p4 }
  0x4e   :  { %1131 = shalt.err (!%p1128_p6)
}
  0x4f   :  { %s1132_s17 = scalar_lea.vmem %s71_s22, 256  ;;  %p1137_p8 = scmp.lt.s32.totalorder %s71_s22, %s71_s22 }
  0x50   :  { %p1133_p7 = scmp.ne.s32.totalorder %s71_s22, %s1132_s17  ;;  %p1138_p9 = scmp.lt.s32.totalorder %s1132_s17, %s1132_s17 }
  0x52   :  { %p1139_p10 = por %p1138_p9, %p1137_p8 }
  0x54   :  { %p1140_p11 = pnand %p1139_p10, %p1133_p7 }
  0x56   :  { %1143 = shalt.err (!%p1140_p11)
}
  0x57   :  { %76 = dma.hbm_to_vmem [thread:$0]  %s1523_s4, 256, %s71_s22, [#allocation9], %s1223_s11, %s1223_s11, %s1224_s12  }
  0x58   :  { %s1231_s20 = smov [#allocation11]   ;;  %s1144_s26 = scalar_lea.hbm %s1524_s5, 16 }
  0x59   :  { %s83_s21 = sshll.u32 %s1231_s20, 4  ;;  %p1145_p12 = scmp.ne.s32.totalorder %s1524_s5, %s1144_s26  ;;  %s84_s21 = int_to_ptr.vmem [resolvable:$true] %s83_s21 }
  0x5a   :  { %p1148_p13 = scmp.lt.u32.totalorder %s1144_s26, %s1524_s5 }
  0x5c   :  { %p1150_p0 = pnand %p1148_p13, %p1145_p12 }
  0x5e   :  { %1153 = shalt.err (!%p1150_p0)
}
  0x5f   :  { %s1154_s0 = scalar_lea.vmem %s84_s21, 16  ;;  %s1158_s4 = scalar_lea.vmem %s84_s21, 32 }
  0x60   :  { %p1155_p1 = scmp.ne.s32.totalorder %s84_s21, %s1154_s0  ;;  %p1159_p2 = scmp.lt.s32.totalorder %s84_s21, %s84_s21 }
  0x61   :  { %p1160_p3 = scmp.lt.s32.totalorder %s1158_s4, %s1154_s0 }
  0x63   :  { %p1161_p4 = por %p1160_p3, %p1159_p2 }
  0x65   :  { %p1162_p5 = pnand %p1161_p4, %p1155_p1 }
  0x67   :  { %1165 = shalt.err (!%p1162_p5)
}
  0x68   :  { %86 = dma.hbm_to_vmem [thread:$0]  %s1524_s5, 16, %s84_s21, [#allocation12]  }
  0x69   :  { %1210 = dma.done.wait [#allocation3], 128  }
  0x6a   :  { %1211 = vsyncadd [#allocation3], 4294967168 }
  0x6b   :  { %1212 = dma.done.wait [#allocation6], 272  }
  0x6c   :  { %1213 = vsyncadd [#allocation6], 4294967024 }
  0x6d   :  { %1214 = dma.done.wait [#allocation9], 512  }
  0x6e   :  { %1215 = vsyncadd [#allocation9], 4294966784 }
  0x6f   :  { %1216 = dma.done.wait [#allocation12], 16  }
  0x70   :  { %1217 = vsyncadd [#allocation12], 4294967280  ;;  %v140_v0 = vlaneseq  ;;  %v1232_v1 = vmov 0.0   ;;  %vm1233_vm0 = vmmov 0   ;;  %v1234_v2 = vmov 1966171168  }
  0x71   :  { %949 = vmatprep.subr.bf16.mxu0 %v1232_v1  ;;  %953 = vmatprep.mubr.msk.bf16.mxu0 %vm1233_vm0, %v1232_v1  ;;  %v138_v3 = vunpack.c.l.s4 %v1234_v2  ;;  %v1020_v6 = vld [vmem:[#allocation5] sm:$0xff]   ;;  %v1021_v7 = vld [vmem:[#allocation5 + $0x8] sm:$0xff]   ;;  %v1379_v9 = vld [vmem:[#allocation2] sm:$0x1]  ;;  %vm194_vm1 = vcmask 261120   ;;  %vm509_vm2 = vcmask 64512  }
  0x72   :  { %957 = vmatprep.subr.bf16.mxu1 %v1232_v1  ;;  %959 = vmatprep.mubr.msk.bf16.mxu1 %vm1233_vm0, %v1232_v1  ;;  %v1374_v5 = vshrl.u32 %v140_v0, 7  ;;  %v1381_v10 = vld [vmem:[#allocation2 + $0x1] sm:$0x1]  ;;  %v1383_v11 = vld [vmem:[#allocation2 + $0x2] sm:$0x1]  ;;  %v286_v45 = vshrl.u32 %v1379_v9, 16 }
  0x73   :  { %v139_v4 = vunpack.c.0.s8 %v138_v3  ;;  %950 = vmatpush3.bf16.msra.mxu0 %v1020_v6  ;;  %v1386_v12 = vld [vmem:[#allocation2 + $0x3] sm:$0x1]  ;;  %v1388_v13 = vld [vmem:[#allocation2 + $0x4] sm:$0x1]  ;;  %v1390_v14 = vld [vmem:[#allocation2 + $0x5] sm:$0x1]  ;;  %v133_v15 = vcombine.low %v1379_v9, %v1381_v10  ;;  %v285_v61 = vpack.i.b16 %v1381_v10, %v1379_v9 }
  0x74   :  { %951 = vmatprep.subr.bf16.mxu0 %v1232_v1  ;;  %v1394_v16 = vld [vmem:[#allocation2 + $0x6] sm:$0x1]  ;;  %v1396_v17 = vld [vmem:[#allocation2 + $0x7] sm:$0x1]  ;;  %v134_v18 = vcombine.low %v1383_v11, %v1386_v12  ;;  %v135_v19 = vcombine.low %v1388_v13, %v1390_v14  ;;  %v1235_v30 = vmov 1983009808   ;;  %v291_v62 = vpack.i.b16 %v1386_v12, %v1383_v11 }
  0x75   :  { %v1377_v8 = vsub.s32 %v139_v4, %v1374_v5  ;;  %v136_v20 = vcombine.low %v1394_v16, %v1396_v17  ;;  %v243_v31 = vunpack.c.l.s4 %v1235_v30  ;;  %v913_v33 = vld [vmem:[#allocation7] ss:$0 sm:$0xff]  ;;  %v1236_v39 = vmov 1934713408   ;;  %s1237_s5 = smov 8   ;;  %s1238_s22 = smov 24  }
  0x76   :  { %v333_v40 = vunpack.c.l.s4 %v1236_v39  ;;  %v287_v46 = vshrl.u32 %v1381_v10, 16  ;;  %v292_v47 = vshrl.u32 %v1383_v11, 16  ;;  %v293_v48 = vshrl.u32 %v1386_v12, 16  ;;  %s1239_s18 = smov 40   ;;  %s1241_s29 = smov 56  }
  0x77   :  { %v143_v21 = vrot.slane %v133_v15, %v1377_v8  ;;  %952 = vmatpush3.bf16.msra.mxu0 %v1021_v7  ;;  %v150_v22 = vrot.slane %v134_v18, %v1377_v8  ;;  %v157_v23 = vrot.slane %v135_v19, %v1377_v8  ;;  %v164_v24 = vrot.slane %v136_v20, %v1377_v8  ;;  %s1242_s30 = smov 48   ;;  %s1243_s8 = smov [#allocation14]  }
  0x78   :  { %963 = vmatprep.subr.bf16.mxu0 %v1232_v1  ;;  %v244_v32 = vunpack.c.0.s8 %v243_v31  ;;  %v298_v49 = vshrl.u32 %v1388_v13, 16  ;;  %v299_v53 = vshrl.u32 %v1390_v14, 16  ;;  %v304_v54 = vshrl.u32 %v1394_v16, 16  ;;  %s897_s9 = sshll.u32 %s1243_s8, 4  ;;  %s898_s9 = int_to_ptr.vmem [resolvable:$true] %s897_s9 }
  0x79   :  { %v165_v25 = vcombine.low %v143_v21, %v150_v22  ;;  %v166_v26 = vcombine.low %v157_v23, %v164_v24  ;;  %v305_v55 = vshrl.u32 %v1396_v17, 16  ;;  %v334_v56 = vunpack.c.0.s8 %v333_v40  ;;  %s1166_s10 = scalar_lea.vmem %s898_s9, 32  ;;  %p1171_p7 = scmp.lt.s32.totalorder %s898_s9, %s898_s9 }
  0x7a   :  { %v1415_v34 = vsub.s32 %v244_v32, %v1374_v5  ;;  %v297_v63 = vpack.i.b16 %v1390_v14, %v1388_v13  ;;  %v303_v0 = vpack.i.b16 %v1396_v17, %v1394_v16  ;;  %v288_v15 = vpack.i.b16 %v287_v46, %v286_v45  ;;  %p1167_p6 = scmp.ne.s32.totalorder %s898_s9, %s1166_s10  ;;  %p1172_p8 = scmp.lt.s32.totalorder %s1166_s10, %s1166_s10 }
  0x7b   :  { %v173_v27 = vrot.slane %v165_v25, %v1377_v8  ;;  %v180_v28 = vrot.slane %v166_v26, %v1377_v8  ;;  %v1438_v7 = vsub.s32 %v334_v56, %v1374_v5  ;;  %v294_v18 = vpack.i.b16 %v293_v48, %v292_v47 }
  0x7c   :  { %v300_v19 = vpack.i.b16 %v299_v53, %v298_v49  ;;  %v306_v12 = vpack.i.b16 %v305_v55, %v304_v54  ;;  %v369_v13 = vcombine.low %v285_v61, %v291_v62  ;;  %v370_v20 = vcombine.low %v297_v63, %v303_v0  ;;  %p1173_p9 = por %p1172_p8, %p1171_p7 }
  0x7d   :  { %v181_v29 = vcombine.low %v173_v27, %v180_v28  ;;  %v439_v21 = vcombine.low %v288_v15, %v294_v18  ;;  %vm651_vm3 = vcmask 1043456   ;;  %vm627_vm4 = vcmask 130048  }
  0x7e   :  { %v440_v23 = vcombine.low %v300_v19, %v306_v12  ;;  %v377_v25 = vrot.slane %v369_v13, %v1377_v8  ;;  %v384_v26 = vrot.slane %v370_v20, %v1377_v8  ;;  %vm629_vm5 = vcmask 195584   ;;  %p1174_p10 = pnand %p1173_p9, %p1167_p6 }
  0x7f   :  { %954 = vmatmul.mubr.msk.bf16.vlgmr.msra.gmra.mrb[0].mxu0 %vm194_vm1, %v181_v29  ;;  %v447_v27 = vrot.slane %v439_v21, %v1377_v8  ;;  %vm632_vm6 = vcmask 326656   ;;  %vm634_vm7 = vcmask 392192   ;;  %vm636_vm8 = vcmask 457728  }
  0x80   :  { %965 = vmatprep.mubr.msk.bf16.mxu0 %vm1233_vm0, %v1232_v1  ;;  %v454_v31 = vrot.slane %v440_v23, %v1377_v8  ;;  %vm638_vm9 = vcmask 517120   ;;  %vm758_vm10 = vcmask 1041409  }
 0x152   :  { %v232_v35 = vpop.f32.mrb[0].mxu0 }
 0x153   :  { %v233_v36 = vadd.f32 %v913_v33, %v232_v35  ;;  %v955_v37 = vpop.f32.mrb[1].mxu0  ;;  %v385_v35 = vcombine.low %v377_v25, %v384_v26 }
 0x154   :  { %v235_v38 = vpop.f32.mrb[2].mxu0  ;;  %v455_v37 = vcombine.low %v447_v27, %v454_v31  ;;  %v1024_v31 = vld [vmem:[#allocation8 + $0x8] sm:$0xff]  }
 0x155   :  { %v241_v41 = vcombine.high %v233_v36, %v233_v36  ;;  %v248_v42 = vrot.slane %v233_v36, %v1415_v34  ;;  %v236_v43 = vadd.f32 %v913_v33, %v235_v38  ;;  %v956_v44 = vpop.f32.mrb[3].mxu0  ;;  %v392_v38 = vrot.slane %v385_v35, %v1377_v8 }
 0x156   :  { %v462_v39 = vrot.slane %v455_v37, %v1377_v8 }
 0x157   :  { %v255_v50 = vrot.slane %v241_v41, %v1415_v34  ;;  %v258_v51 = vcombine.high %v236_v43, %v236_v43  ;;  %v265_v52 = vrot.slane %v236_v43, %v1415_v34  ;;  %v256_v57 = vcombine.high %v248_v42, %v248_v42 }
 0x159   :  { %v272_v58 = vrot.slane %v258_v51, %v1415_v34  ;;  %v273_v59 = vcombine.high %v265_v52, %v265_v52  ;;  %v917_v60 = vpack.c.bf16 %v265_v52, %v248_v42  ;;  %v257_v2 = vcombine.high %v255_v50, %v255_v50 }
 0x15b   :  { %v274_v3 = vcombine.high %v272_v58, %v272_v58  ;;  %v918_v4 = vpack.c.bf16 %v272_v58, %v255_v50  ;;  %v919_v6 = vpack.c.bf16 %v273_v59, %v256_v57  ;;  %v322_v9 = vrot.slane %v917_v60, %v1415_v34 }
 0x15c   :  { %v701_v59 = vsel %vm651_vm3, %v462_v39, 0  ;;  %v652_v60 = vsel %vm651_vm3, %v392_v38, 0 }
 0x15d   :  { %v920_v10 = vpack.c.bf16 %v274_v3, %v257_v2  ;;  %v330_v11 = vrot.slane %v918_v4, %v1415_v34  ;;  %v346_v16 = vrot.slane %v919_v6, %v1415_v34 }
 0x15f   :  { %v331_v14 = vcombine.low %v322_v9, %v330_v11  ;;  %v354_v17 = vrot.slane %v920_v10, %v1415_v34 }
 0x161   :  { %v338_v5 = vrot.slane %v331_v14, %v1438_v7  ;;  %v355_v22 = vcombine.low %v346_v16, %v354_v17 }
 0x163   :  { %v362_v24 = vrot.slane %v355_v22, %v1438_v7  ;;  %v366_v29 = vshrl.u32 %v338_v5, 16 }
 0x165   :  { %v365_v28 = vpack.i.b16 %v362_v24, %v338_v5  ;;  %v367_v30 = vshrl.u32 %v362_v24, 16 }
 0x167   :  { %v397_v32 = vsel %vm194_vm1, %v365_v28, 0  ;;  %v368_v33 = vpack.i.b16 %v367_v30, %v366_v29  ;;  %v1022_v29 = vld [vmem:[#allocation8] sm:$0xff]   ;;  %v1023_v30 = vld [vmem:[#allocation10] sm:$0xff]  }
 0x168   :  { %958 = vmatpush3.bf16.xpose.msra.mxu1 %v397_v32  ;;  %v641_v32 = vld [vmem:[#allocation2 + $0x7] sm:$0x1] }
 0x169   :  { %v467_v36 = vsel %vm194_vm1, %v368_v33, 0  ;;  %969 = vmatprep.subr.bf16.mxu1 %v1232_v1 }
 0x16a   :  { %964 = vmatpush3.bf16.xpose.msra.mxu0 %v467_v36 }
 0x16b   :  { %975 = vmatprep.subr.bf16.mxu0 %v1232_v1 }
 0x16f   :  { %960 = vmatmul.mubr.msk.bf16.vlgmr.msra.gmra.mrb[0].mxu1 %vm194_vm1, %v392_v38 }
 0x170   :  { %971 = vmatprep.mubr.msk.bf16.mxu1 %vm1233_vm0, %v1232_v1  ;;  %970 = vmatpush3.bf16.msra.mxu1 %v652_v60 }
 0x171   :  { %966 = vmatmul.mubr.msk.bf16.vlgmr.msra.gmra.mrb[4].mxu0 %vm194_vm1, %v462_v39  ;;  %981 = vmatprep.subr.bf16.mxu1 %v1232_v1 }
 0x172   :  { %977 = vmatprep.mubr.msk.bf16.mxu0 %vm1233_vm0, %v1232_v1  ;;  %976 = vmatpush3.bf16.msra.mxu0 %v701_v59 }
 0x173   :  { %989 = vmatprep.subr.bf16.mxu0 %v1232_v1 }
 0x242   :  { %v433_v40 = vpop.f32.mrb[0].mxu1 }
 0x243   :  { %v961_v41 = vpop.f32.mrb[1].mxu1  ;;  %v510_v48 = vsel %vm509_vm2, %v433_v40, -inf }
 0x244   :  { %v503_v42 = vpop.f32.mrb[4].mxu0  ;;  %v436_v43 = vpop.f32.mrb[2].mxu1 }
 0x245   :  { %v967_v44 = vpop.f32.mrb[5].mxu0  ;;  %v513_v45 = vsel %vm509_vm2, %v503_v42, -inf  ;;  %v962_v46 = vpop.f32.mrb[3].mxu1 }
 0x246   :  { %514 = vmax.xlane.f32.xlu0 %v513_v45  ;;  %v506_v8 = vpop.f32.mrb[6].mxu0 }
 0x247   :  { %v968_v47 = vpop.f32.mrb[7].mxu0 }
 0x24a   :  { %511 = vmax.xlane.f32.xlu0 %v510_v48 }
 0x2d3   :  { %v515_v49 = vpop.xlane.xlu0 %514 }
 0x2d4   :  { %v517_v50 = vsub.f32 %v503_v42, %v515_v49 }
 0x2d6   :  { %v520_v51 = vmul.f32 1.442695, %v517_v50 }
 0x2d7   :  { %v512_v52 = vpop.xlane.xlu0 %511 }
 0x2d8   :  { %1026 = vpow2.f32 %v520_v51  ;;  %v516_v53 = vsub.f32 %v433_v40, %v512_v52 }
 0x2da   :  { %v518_v54 = vmul.f32 1.442695, %v516_v53 }
 0x2dc   :  { %1028 = vpow2.f32 %v518_v54 }
 0x2e2   :  { %v1027_v55 = vpop.eup %1026 }
 0x2e3   :  { %v525_v56 = vsel %vm509_vm2, %v1027_v55, 0.0 }
 0x2e4   :  { %526 = vadd.xlane.f32.xlu1 %v525_v56 }
 0x2e6   :  { %v1029_v57 = vpop.eup %1028 }
 0x2e7   :  { %v522_v58 = vsel %vm509_vm2, %v1029_v57, 0.0 }
 0x2e8   :  { %523 = vadd.xlane.f32.xlu1 %v522_v58 }
 0x371   :  { %v527_v61 = vpop.xlane.xlu1 %526 }
 0x372   :  { %1030 = vrcp.f32 %v527_v61 }
 0x375   :  { %v524_v62 = vpop.xlane.xlu1 %523 }
 0x376   :  { %1032 = vrcp.f32 %v524_v62 }
 0x37c   :  { %v1031_v63 = vpop.eup %1030 }
 0x37d   :  { %v531_v0 = vmul.f32 %v1031_v63, %v1027_v55 }
 0x37f   :  { %v643_v2 = vpack.c.bf16 %v531_v0, %v531_v0  ;;  %v547_v4 = vcombine.high %v531_v0, %v1232_v1  ;;  %v554_v18 = vrot.slane %v531_v0, %v1415_v34 }
 0x380   :  { %v1033_v3 = vpop.eup %1032 }
 0x381   :  { %v529_v6 = vmul.f32 %v1033_v3, %v1029_v57  ;;  %v695_v15 = vshrl.u32 %v643_v2, 16  ;;  %v561_v12 = vrot.slane %v547_v4, %v1415_v34 }
 0x383   :  { %v697_v19 = vrot.slane %v695_v15, 3  ;;  %v642_v9 = vpack.c.bf16 %v529_v6, %v529_v6  ;;  %v539_v10 = vrot.slane %v529_v6, %v1415_v34  ;;  %v532_v11 = vcombine.high %v529_v6, %v1232_v1 }
 0x385   :  { %978 = vmatmul.mubr.msk.bf16.vlgmr.msra.gmra.mrb[8].mxu0 %vm509_vm2, %v697_v19  ;;  %v645_v13 = vshrl.u32 %v642_v9, 16  ;;  %v563_v14 = vcombine.high %v539_v10, %v554_v18  ;;  %v562_v16 = vcombine.low %v539_v10, %v554_v18  ;;  %v546_v17 = vrot.slane %v532_v11, %v1415_v34 }
 0x386   :  { %993 = vmatprep.mubr.msk.bf16.mxu0 %vm1233_vm0, %v1232_v1  ;;  %990 = vmatpush3.bf16.msra.mxu0 %v1022_v29 }
 0x387   :  { %v647_v20 = vrot.slane %v645_v13, 3  ;;  %v577_v21 = vrot.slane %v563_v14, %v1438_v7  ;;  %v570_v5 = vrot.slane %v562_v16, %v1438_v7  ;;  %v578_v22 = vcombine.low %v546_v17, %v561_v12  ;;  %991 = vmatprep.subr.bf16.mxu0 %v1232_v1 }
 0x388   :  { %v579_v25 = vcombine.high %v546_v17, %v561_v12 }
 0x389   :  { %972 = vmatmul.mubr.msk.bf16.vlgmr.msra.gmra.mrb[4].mxu1 %vm509_vm2, %v647_v20  ;;  %603 = vrot.lane.b32.xlu1 %v577_v21, %s1227_s3  ;;  %v594_v23 = vcombine.high %v570_v5, %v1232_v1  ;;  %v586_v24 = vrot.slane %v578_v22, %v1438_v7  ;;  %v595_v34 = vcombine.high %v577_v21, %v1232_v1  ;;  %s1240_s3 = smov 32  }
 0x38a   :  { %985 = vmatprep.mubr.msk.bf16.mxu1 %vm1233_vm0, %v1232_v1  ;;  %v593_v27 = vrot.slane %v579_v25, %v1438_v7  ;;  %982 = vmatpush3.bf16.msra.mxu1 %v1023_v30  ;;  %v1025_v7 = vld [vmem:[#allocation10 + $0x8] sm:$0xff]  }
 0x38b   :  { %599 = vrot.lane.b32.xlu0 %v594_v23, %s1237_s5  ;;  %v596_v26 = vcombine.high %v586_v24, %v1232_v1  ;;  %992 = vmatpush3.bf16.msra.mxu0 %v1024_v31 }
 0x38c   :  { %v597_v28 = vcombine.high %v593_v27, %v1232_v1  ;;  %983 = vmatprep.subr.bf16.mxu1 %v1232_v1 }
 0x38d   :  { %607 = vrot.lane.b32.xlu1 %v595_v34, %s1238_s22 }
 0x38e   :  { %984 = vmatpush3.bf16.msra.mxu1 %v1025_v7  ;;  %994 = vmatmul.mubr.msk.bf16.vlgmr.msra.gmra.mrb[12].mxu0 %vm194_vm1, %v641_v32 }
 0x38f   :  { %615 = vrot.lane.b32.xlu0 %v596_v26, %s1239_s18 }
 0x391   :  { %611 = vrot.lane.b32.xlu1 %v586_v24, %s1240_s3 }
 0x393   :  { %623 = vrot.lane.b32.xlu0 %v597_v28, %s1241_s29 }
 0x395   :  { %619 = vrot.lane.b32.xlu1 %v593_v27, %s1242_s30 }
 0x3fb   :  { %v604_v33 = vpop.permute.xlu1 %603 }
 0x3fd   :  { %v600_v35 = vpop.permute.xlu0 %599 }
 0x3fe   :  { %v626_v36 = vsel %vm509_vm2, %v570_v5, %v600_v35 }
 0x3ff   :  { %v608_v37 = vpop.permute.xlu1 %607  ;;  %v628_v38 = vsel %vm627_vm4, %v626_v36, %v604_v33 }
 0x400   :  { %v630_v40 = vsel %vm629_vm5, %v628_v38, %v608_v37 }
 0x401   :  { %v616_v39 = vpop.permute.xlu0 %615 }
 0x403   :  { %v612_v41 = vpop.permute.xlu1 %611 }
 0x404   :  { %v631_v42 = vsel %vm194_vm1, %v630_v40, %v612_v41 }
 0x405   :  { %v633_v43 = vsel %vm632_vm6, %v631_v42, %v616_v39  ;;  %v624_v44 = vpop.permute.xlu0 %623 }
 0x407   :  { %v620_v1 = vpop.permute.xlu1 %619 }
 0x408   :  { %v635_v45 = vsel %vm634_vm7, %v633_v43, %v620_v1 }
 0x409   :  { %v637_v46 = vsel %vm636_vm8, %v635_v45, %v624_v44 }
 0x40a   :  { %639 = vst.msk [vmem:[#allocation14] sm:$0x3] %vm638_vm9, %v637_v46 }
 0x458   :  { %v737_v8 = vpop.f32.mrb[8].mxu0 }
 0x459   :  { %v748_v47 = vpack.c.bf16 %v737_v8, %v737_v8  ;;  %v979_v48 = vpop.f32.mrb[9].mxu0 }
 0x45a   :  { %v740_v49 = vpop.f32.mrb[10].mxu0 }
 0x45b   :  { %v756_v50 = vunpack.c.l.b16 %v748_v47  ;;  %v980_v51 = vpop.f32.mrb[11].mxu0 }
 0x45c   :  { %v688_v52 = vpop.f32.mrb[4].mxu1 }
 0x45d   :  { %v747_v53 = vpack.c.bf16 %v688_v52, %v688_v52  ;;  %v973_v54 = vpop.f32.mrb[5].mxu1  ;;  %v757_v56 = vrot.slane %v756_v50, 7 }
 0x45e   :  { %v691_v55 = vpop.f32.mrb[6].mxu1 }
 0x45f   :  { %v755_v57 = vunpack.c.l.b16 %v747_v53  ;;  %v974_v58 = vpop.f32.mrb[7].mxu1 }
 0x461   :  { %v759_v59 = vsel %vm758_vm10, %v757_v56, %v755_v57  ;;  %v865_v61 = vpop.f32.mrb[12].mxu0 }
 0x462   :  { %v760_v60 = vpack.c.b16 %v759_v59, %v759_v59  ;;  %v995_v62 = vpop.f32.mrb[13].mxu0 }
 0x463   :  { %v868_v63 = vpop.f32.mrb[14].mxu0 }
 0x464   :  { %986 = vmatmul.mubr.msk.bf16.vlgmr.msra.gmra.mrb[8].mxu1 %vm194_vm1, %v760_v60  ;;  %v996_v0 = vpop.f32.mrb[15].mxu0 }
 0x465   :  { %1177 = shalt.err (!%p1174_p10)
}
 0x466   :  { %s1178_s15 = scalar_lea.hbm %s1526_s7, 32 }
 0x467   :  { %p1179_p11 = scmp.ne.s32.totalorder %s1526_s7, %s1178_s15  ;;  %p1182_p12 = scmp.lt.u32.totalorder %s1178_s15, %s1526_s7 }
 0x469   :  { %p1184_p13 = pnand %p1182_p12, %p1179_p11 }
 0x46b   :  { %1187 = shalt.err (!%p1184_p13)
}
 0x46c   :  { %900 = dma.vmem_to_hbm [thread:$0]  %s898_s9, 32, %s1526_s7, [#allocation15]   ;;  %v931_v3 = vld [vmem:[#allocation11] ss:$0 sm:$0xff]  ;;  %vm879_vm11 = vcmask 25600  }
 0x46d   :  { %s1244_s23 = smov [#allocation13]  }
 0x46e   :  { %s887_s24 = sshll.u32 %s1244_s23, 4  ;;  %s888_s24 = int_to_ptr.vmem [resolvable:$true] %s887_s24 }
 0x46f   :  { %s1188_s26 = scalar_lea.vmem %s888_s24, 32  ;;  %p1193_p1 = scmp.lt.s32.totalorder %s888_s24, %s888_s24 }
 0x470   :  { %p1189_p0 = scmp.ne.s32.totalorder %s888_s24, %s1188_s26  ;;  %p1194_p2 = scmp.lt.s32.totalorder %s1188_s26, %s1188_s26 }
 0x472   :  { %p1195_p3 = por %p1194_p2, %p1193_p1 }
 0x474   :  { %p1196_p4 = pnand %p1195_p3, %p1189_p0 }
 0x537   :  { %v810_v2 = vpop.f32.mrb[8].mxu1 }
 0x538   :  { %v866_v4 = vadd.f32 %v865_v61, %v810_v2  ;;  %v987_v6 = vpop.f32.mrb[9].mxu1 }
 0x539   :  { %v813_v15 = vpop.f32.mrb[10].mxu1 }
 0x53a   :  { %v878_v18 = vadd.f32 %v931_v3, %v866_v4  ;;  %v988_v19 = vpop.f32.mrb[11].mxu1 }
 0x53c   :  { %880 = vst.msk [vmem:[#allocation13] sm:$0x3] %vm879_vm11, %v878_v18 }
 0x53d   :  { %1199 = shalt.err (!%p1196_p4)
}
 0x53e   :  { %s1200_s25 = scalar_lea.hbm %s1525_s6, 32 }
 0x53f   :  { %p1201_p5 = scmp.ne.s32.totalorder %s1525_s6, %s1200_s25  ;;  %p1204_p6 = scmp.lt.u32.totalorder %s1200_s25, %s1525_s6 }
 0x541   :  { %p1206_p7 = pnand %p1204_p6, %p1201_p5 }
 0x543   :  { %1209 = shalt.err (!%p1206_p7)
}
 0x544   :  { %890 = dma.vmem_to_hbm [thread:$0]  %s888_s24, 32, %s1525_s6, [#allocation4]  }
 0x545   :  { %1218 = dma.done.wait [#allocation4], 32  }
 0x546   :  { %1219 = vsyncadd [#allocation4], 4294967264 }
 0x547   :  { %1220 = dma.done.wait [#allocation15], 32  }
 0x548   :  { %1221 = vsyncadd [#allocation15], 4294967264 }
 0x549   :  { %907 = vsyncpa [#allocation3], 1 }
 0x54a   :  { %908 = vsyncpa [#allocation6], 1 }
 0x54b   :  { %909 = vsyncpa [#allocation9], 1 }
 0x54c   :  { %910 = vsyncpa [#allocation12], 1 }
 0x54d   :  { %911 = vsyncpa [#allocation4], 1 }
 0x54e   :  { %912 = vsyncpa [#allocation15], 1 }

// kernel: lstm_with_attention_forward.4
= control target key start
LH: loop header
LB: loop body
LE: loop exit
PB: predicated region body
PF: predicated region fallthrough
CT: control target
= control target key end

     0   :  { %7 = vsyncpa [#allocation5], 0  ;;  %s1340_s0 = inlined_call_operand.hbm [shape: bf16[8,2,128], index: 0, kind: input, shape index: {}]   ;;  %s1341_s1 = inlined_call_operand.hbm [shape: bf16[32,128], index: 1, kind: input, shape index: {}]   ;;  %s1342_s2 = inlined_call_operand.hbm [shape: bf16[8,2,32], index: 2, kind: output, shape index: {}]  }
   0x1   :  { %8 = vsyncpa [#allocation8], 0 }
   0x2   :  { %9 = vsyncpa [#allocation6], 0  ;;  %s1129_s9 = smov [#allocation4]   ;;  %s1057_s13 = scalar_lea.hbm %s1340_s0, 128 }
   0x3   :  { %s15_s10 = sshll.u32 %s1129_s9, 4  ;;  %p1058_p0 = scmp.ne.s32.totalorder %s1340_s0, %s1057_s13  ;;  %s16_s10 = int_to_ptr.vmem [resolvable:$true] %s15_s10 }
   0x4   :  { %p1061_p1 = scmp.lt.u32.totalorder %s1057_s13, %s1340_s0 }
   0x6   :  { %p1063_p2 = pnand %p1061_p1, %p1058_p0 }
   0x8   :  { %1066 = shalt.err (!%p1063_p2)
}
   0x9   :  { %s1067_s18 = scalar_lea.vmem %s16_s10, 128  ;;  %p1072_p4 = scmp.lt.s32.totalorder %s16_s10, %s16_s10 }
   0xa   :  { %p1068_p3 = scmp.ne.s32.totalorder %s16_s10, %s1067_s18  ;;  %p1073_p5 = scmp.lt.s32.totalorder %s1067_s18, %s1067_s18 }
   0xc   :  { %p1074_p6 = por %p1073_p5, %p1072_p4 }
   0xe   :  { %p1075_p7 = pnand %p1074_p6, %p1068_p3 }
  0x10   :  { %1078 = shalt.err (!%p1075_p7)
}
  0x11   :  { %s1130_s19 = smov 16   ;;  %s1131_s20 = smov 1  }
  0x12   :  { %21 = dma.hbm_to_vmem [thread:$0]  %s1340_s0, 128, %s16_s10, [#allocation5], %s1130_s19, %s1130_s19, %s1131_s20  }
  0x13   :  { %s1132_s23 = smov [#allocation7]   ;;  %s1079_s27 = scalar_lea.hbm %s1341_s1, 256 }
  0x14   :  { %s27_s24 = sshll.u32 %s1132_s23, 4  ;;  %p1080_p8 = scmp.ne.s32.totalorder %s1341_s1, %s1079_s27  ;;  %s28_s24 = int_to_ptr.vmem [resolvable:$true] %s27_s24 }
  0x15   :  { %p1083_p9 = scmp.lt.u32.totalorder %s1079_s27, %s1341_s1 }
  0x17   :  { %p1085_p10 = pnand %p1083_p9, %p1080_p8 }
  0x19   :  { %1088 = shalt.err (!%p1085_p10)
}
  0x1a   :  { %s1089_s4 = scalar_lea.vmem %s28_s24, 256  ;;  %p1094_p12 = scmp.lt.s32.totalorder %s28_s24, %s28_s24 }
  0x1b   :  { %p1090_p11 = scmp.ne.s32.totalorder %s28_s24, %s1089_s4  ;;  %p1095_p13 = scmp.lt.s32.totalorder %s1089_s4, %s1089_s4 }
  0x1d   :  { %p1096_p0 = por %p1095_p13, %p1094_p12 }
  0x1f   :  { %p1097_p1 = pnand %p1096_p0, %p1090_p11 }
  0x21   :  { %1100 = shalt.err (!%p1097_p1)
}
  0x22   :  { %s1133_s0 = smov 64   ;;  %s1134_s5 = smov 4  }
  0x23   :  { %33 = dma.hbm_to_vmem [thread:$0]  %s1341_s1, 256, %s28_s24, [#allocation8], %s1133_s0, %s1133_s0, %s1134_s5  }
  0x24   :  { %1123 = dma.done.wait [#allocation5], 128  }
  0x25   :  { %1124 = vsyncadd [#allocation5], 4294967168 }
  0x26   :  { %1125 = dma.done.wait [#allocation8], 256  }
  0x27   :  { %1126 = vsyncadd [#allocation8], 4294967040  ;;  %vm45_vm0 = vcmask 254976   ;;  %v1135_v0 = vmov 0.0   ;;  %vm1136_vm1 = vmmov 0   ;;  %v1196_v1 = vld [vmem:[#allocation7] sm:$0xff]  }
  0x28   :  { %914 = vmatprep.subr.bf16.mxu0 %v1135_v0  ;;  %918 = vmatprep.mubr.msk.bf16.mxu0 %vm1136_vm1, %v1135_v0  ;;  %46 = vst.msk [vmem:[#allocation2] sm:$0x3] %vm45_vm0, %v1135_v0  ;;  %47 = vst.msk [vmem:[#allocation3] sm:$0x3] %vm45_vm0, %v1135_v0  ;;  %v1199_v2 = vld [vmem:[#allocation7 + $0x8] sm:$0xff]   ;;  %vm69_vm2 = vcmask 261120  }
  0x29   :  { %922 = vmatprep.subr.bf16.mxu1 %v1135_v0  ;;  %926 = vmatprep.mubr.msk.bf16.mxu1 %vm1136_vm1, %v1135_v0  ;;  %v54_v5 = vld [vmem:[#allocation4] sm:$0x1]  ;;  %s1137_s1 = smov 32   ;;  %v171_v29 = vld [vmem:[#allocation4 + $0x1] sm:$0x1]  ;;  %vm168_vm3 = vcmask 253952  }
  0x2a   :  { %915 = vmatpush3.bf16.msra.mxu0 %v1196_v1  ;;  %923 = vmatpush3.bf16.msra.mxu1 %v1196_v1  ;;  %v55_v6 = vunpack.c.l.bf16 %v54_v5  ;;  %v172_v30 = vunpack.c.l.bf16 %v171_v29  ;;  %v265_v51 = vld [vmem:[#allocation4 + $0x2] sm:$0x1]  ;;  %s1140_s8 = smov 96   ;;  %s1141_s9 = smov [#allocation9]  }
  0x2b   :  { %916 = vmatprep.subr.bf16.mxu0 %v1135_v0  ;;  %924 = vmatprep.subr.bf16.mxu1 %v1135_v0  ;;  %v266_v52 = vunpack.c.l.bf16 %v265_v51  ;;  %s858_s10 = sshll.u32 %s1141_s9, 4  ;;  %s859_s10 = int_to_ptr.vmem [resolvable:$true] %s858_s10 }
  0x2c   :  { %s1101_s11 = scalar_lea.vmem %s859_s10, 128  ;;  %p1106_p3 = scmp.lt.s32.totalorder %s859_s10, %s859_s10 }
  0x2d   :  { %p1102_p2 = scmp.ne.s32.totalorder %s859_s10, %s1101_s11  ;;  %p1107_p4 = scmp.lt.s32.totalorder %s1101_s11, %s1101_s11 }
  0x2e   :  { %917 = vmatpush3.bf16.msra.mxu0 %v1199_v2  ;;  %925 = vmatpush3.bf16.msra.mxu1 %v1199_v2 }
  0x2f   :  { %v52_v3 = vld [vmem:[#allocation2] sm:$0x3]  ;;  %930 = vmatprep.subr.bf16.mxu0 %v1135_v0  ;;  %938 = vmatprep.subr.bf16.mxu1 %v1135_v0  ;;  %v875_v13 = vld.sshfl [vmem:[#allocation3] sm:$0x3 pattern:$0x76325410]  ;;  %p1108_p5 = por %p1107_p4, %p1106_p3 }
  0x30   :  { %v56_v4 = vpack.c.bf16 %v52_v3, %v52_v3 }
  0x31   :  { %p1109_p6 = pnand %p1108_p5, %p1102_p2 }
  0x32   :  { %919 = vmatmul.mubr.msk.bf16.vlgmr.msra.gmra.mrb[0].mxu0 %vm69_vm2, %v56_v4 }
  0x33   :  { %931 = vmatpush3.bf16.msra.mxu0 %v1196_v1  ;;  %934 = vmatprep.mubr.msk.bf16.mxu0 %vm1136_vm1, %v1135_v0 }
  0x34   :  { %932 = vmatprep.subr.bf16.mxu0 %v1135_v0 }
  0x37   :  { %933 = vmatpush3.bf16.msra.mxu0 %v1199_v2 }
  0x38   :  { %946 = vmatprep.subr.bf16.mxu0 %v1135_v0 }
 0x105   :  { %v107_v7 = vpop.f32.mrb[0].mxu0 }
 0x106   :  { %v113_v8 = vadd.f32 %v107_v7, %v55_v6  ;;  %v920_v9 = vpop.f32.mrb[1].mxu0 }
 0x107   :  { %v110_v10 = vpop.f32.mrb[2].mxu0 }
 0x108   :  { %v921_v11 = vpop.f32.mrb[3].mxu0  ;;  %993 = vtanh.f32 %v113_v8  ;;  %v874_v14 = vmul.f32 -1.442695, %v113_v8 }
 0x10a   :  { %995 = vpow2.f32 %v874_v14 }
 0x112   :  { %v994_v12 = vpop.eup %993 }
 0x113   :  { %134 = vrot.lane.b32.xlu0 %v994_v12, %s1133_s0  ;;  %v359_v12 = vld [vmem:[#allocation4 + $0x3] sm:$0x1] }
 0x114   :  { %v996_v15 = vpop.eup %995 }
 0x115   :  { %v117_v16 = vadd.f32 1.0, %v996_v15 }
 0x117   :  { %129 = vrot.lane.b32.xlu0 %v875_v13, %s1137_s1  ;;  %997 = vrcp.f32 %v117_v16  ;;  %v360_v13 = vunpack.c.l.bf16 %v359_v12 }
 0x121   :  { %v998_v17 = vpop.eup %997 }
 0x185   :  { %v135_v18 = vpop.permute.xlu0 %134 }
 0x186   :  { %v137_v19 = vmul.f32 %v998_v17, %v135_v18 }
 0x188   :  { %139 = vrot.lane.b32.xlu1 %v137_v19, %s1137_s1 }
 0x189   :  { %v130_v20 = vpop.permute.xlu0 %129 }
 0x18a   :  { %v132_v21 = vmul.f32 %v998_v17, %v130_v20 }
 0x1fa   :  { %v140_v22 = vpop.permute.xlu1 %139 }
 0x1fb   :  { %v142_v23 = vadd.f32 %v140_v22, %v132_v21 }
 0x1fd   :  { %999 = vtanh.f32 %v142_v23 }
 0x207   :  { %v1000_v24 = vpop.eup %999 }
 0x208   :  { %145 = vrot.lane.b32.xlu1 %v1000_v24, %s1133_s0 }
 0x27a   :  { %v146_v25 = vpop.permute.xlu1 %145 }
 0x27b   :  { %v148_v26 = vmul.f32 %v998_v17, %v146_v25 }
 0x27d   :  { %v1219_v27 = vpack.c.bf16 %v148_v26, %v148_v26 }
 0x27f   :  { %173 = vrot.lane.b32.xlu0 %v1219_v27, %s1137_s1 }
 0x2f1   :  { %v174_v28 = vpop.permute.xlu0 %173 }
 0x2f2   :  { %927 = vmatmul.mubr.msk.bf16.vlgmr.msra.gmra.mrb[0].mxu1 %vm69_vm2, %v174_v28 }
 0x2f3   :  { %939 = vmatpush3.bf16.msra.mxu1 %v1196_v1  ;;  %942 = vmatprep.mubr.msk.bf16.mxu1 %vm1136_vm1, %v1135_v0 }
 0x2f4   :  { %940 = vmatprep.subr.bf16.mxu1 %v1135_v0 }
 0x2f7   :  { %941 = vmatpush3.bf16.msra.mxu1 %v1199_v2 }
 0x2f8   :  { %954 = vmatprep.subr.bf16.mxu1 %v1135_v0 }
 0x3c5   :  { %v212_v31 = vpop.f32.mrb[0].mxu1 }
 0x3c6   :  { %v218_v32 = vadd.f32 %v212_v31, %v172_v30  ;;  %v928_v33 = vpop.f32.mrb[1].mxu1 }
 0x3c7   :  { %v215_v34 = vpop.f32.mrb[2].mxu1 }
 0x3c8   :  { %1001 = vtanh.f32 %v218_v32  ;;  %v929_v35 = vpop.f32.mrb[3].mxu1  ;;  %v877_v37 = vmul.f32 -1.442695, %v218_v32 }
 0x3c9   :  { %v453_v35 = vld [vmem:[#allocation4 + $0x4] sm:$0x1] }
 0x3ca   :  { %1003 = vpow2.f32 %v877_v37 }
 0x3d2   :  { %v1002_v36 = vpop.eup %1001 }
 0x3d3   :  { %228 = vrot.lane.b32.xlu1 %v1002_v36, %s1133_s0  ;;  %v454_v36 = vunpack.c.l.bf16 %v453_v35 }
 0x3d4   :  { %v1004_v38 = vpop.eup %1003 }
 0x3d5   :  { %v222_v39 = vadd.f32 1.0, %v1004_v38 }
 0x3d7   :  { %1005 = vrcp.f32 %v222_v39 }
 0x3e1   :  { %v1006_v40 = vpop.eup %1005 }
 0x3e2   :  { %v226_v43 = vmul.f32 %v1006_v40, %v142_v23 }
 0x445   :  { %v229_v41 = vpop.permute.xlu1 %228 }
 0x446   :  { %v231_v42 = vmul.f32 %v1006_v40, %v229_v41 }
 0x448   :  { %233 = vrot.lane.b32.xlu0 %v231_v42, %s1137_s1 }
 0x4ba   :  { %v234_v44 = vpop.permute.xlu0 %233 }
 0x4bb   :  { %v236_v45 = vadd.f32 %v234_v44, %v226_v43 }
 0x4bd   :  { %1007 = vtanh.f32 %v236_v45 }
 0x4c7   :  { %v1008_v46 = vpop.eup %1007 }
 0x4c8   :  { %239 = vrot.lane.b32.xlu1 %v1008_v46, %s1133_s0 }
 0x53a   :  { %v240_v47 = vpop.permute.xlu1 %239 }
 0x53b   :  { %v242_v48 = vmul.f32 %v1006_v40, %v240_v47 }
 0x53d   :  { %v1233_v49 = vpack.c.bf16 %v242_v48, %v242_v48 }
 0x53f   :  { %267 = vrot.lane.b32.xlu0 %v1233_v49, %s1137_s1 }
 0x5b1   :  { %v268_v50 = vpop.permute.xlu0 %267 }
 0x5b2   :  { %935 = vmatmul.mubr.msk.bf16.vlgmr.msra.gmra.mrb[4].mxu0 %vm69_vm2, %v268_v50 }
 0x5b3   :  { %947 = vmatpush3.bf16.msra.mxu0 %v1196_v1  ;;  %950 = vmatprep.mubr.msk.bf16.mxu0 %vm1136_vm1, %v1135_v0 }
 0x5b4   :  { %948 = vmatprep.subr.bf16.mxu0 %v1135_v0 }
 0x5b7   :  { %949 = vmatpush3.bf16.msra.mxu0 %v1199_v2 }
 0x5b8   :  { %962 = vmatprep.subr.bf16.mxu0 %v1135_v0 }
 0x685   :  { %v306_v53 = vpop.f32.mrb[4].mxu0 }
 0x686   :  { %v312_v54 = vadd.f32 %v306_v53, %v266_v52  ;;  %v936_v55 = vpop.f32.mrb[5].mxu0 }
 0x687   :  { %v309_v56 = vpop.f32.mrb[6].mxu0 }
 0x688   :  { %1009 = vtanh.f32 %v312_v54  ;;  %v937_v57 = vpop.f32.mrb[7].mxu0  ;;  %v879_v59 = vmul.f32 -1.442695, %v312_v54 }
 0x68a   :  { %1011 = vpow2.f32 %v879_v59 }
 0x692   :  { %v1010_v58 = vpop.eup %1009 }
 0x693   :  { %322 = vrot.lane.b32.xlu1 %v1010_v58, %s1133_s0  ;;  %v547_v58 = vld [vmem:[#allocation4 + $0x5] sm:$0x1] }
 0x694   :  { %v1012_v60 = vpop.eup %1011  ;;  %v548_v59 = vunpack.c.l.bf16 %v547_v58 }
 0x695   :  { %v316_v61 = vadd.f32 1.0, %v1012_v60 }
 0x697   :  { %1013 = vrcp.f32 %v316_v61 }
 0x6a1   :  { %v1014_v62 = vpop.eup %1013 }
 0x6a2   :  { %v320_v4 = vmul.f32 %v1014_v62, %v236_v45 }
 0x705   :  { %v323_v63 = vpop.permute.xlu1 %322 }
 0x706   :  { %v325_v3 = vmul.f32 %v1014_v62, %v323_v63 }
 0x708   :  { %327 = vrot.lane.b32.xlu0 %v325_v3, %s1137_s1 }
 0x77a   :  { %v328_v5 = vpop.permute.xlu0 %327 }
 0x77b   :  { %v330_v6 = vadd.f32 %v328_v5, %v320_v4 }
 0x77d   :  { %1015 = vtanh.f32 %v330_v6 }
 0x787   :  { %v1016_v7 = vpop.eup %1015 }
 0x788   :  { %333 = vrot.lane.b32.xlu1 %v1016_v7, %s1133_s0 }
 0x7fa   :  { %v334_v8 = vpop.permute.xlu1 %333 }
 0x7fb   :  { %v336_v9 = vmul.f32 %v1014_v62, %v334_v8 }
 0x7fd   :  { %v1247_v10 = vpack.c.bf16 %v336_v9, %v336_v9 }
 0x7ff   :  { %361 = vrot.lane.b32.xlu0 %v1247_v10, %s1137_s1 }
 0x871   :  { %v362_v11 = vpop.permute.xlu0 %361 }
 0x872   :  { %943 = vmatmul.mubr.msk.bf16.vlgmr.msra.gmra.mrb[4].mxu1 %vm69_vm2, %v362_v11 }
 0x873   :  { %955 = vmatpush3.bf16.msra.mxu1 %v1196_v1  ;;  %958 = vmatprep.mubr.msk.bf16.mxu1 %vm1136_vm1, %v1135_v0 }
 0x874   :  { %956 = vmatprep.subr.bf16.mxu1 %v1135_v0 }
 0x877   :  { %957 = vmatpush3.bf16.msra.mxu1 %v1199_v2 }
 0x878   :  { %970 = vmatprep.subr.bf16.mxu1 %v1135_v0 }
 0x945   :  { %v400_v14 = vpop.f32.mrb[4].mxu1 }
 0x946   :  { %v406_v15 = vadd.f32 %v400_v14, %v360_v13  ;;  %v944_v16 = vpop.f32.mrb[5].mxu1 }
 0x947   :  { %v403_v17 = vpop.f32.mrb[6].mxu1 }
 0x948   :  { %1017 = vtanh.f32 %v406_v15  ;;  %v945_v18 = vpop.f32.mrb[7].mxu1  ;;  %v881_v20 = vmul.f32 -1.442695, %v406_v15  ;;  %v641_v17 = vld [vmem:[#allocation4 + $0x6] sm:$0x1] }
 0x949   :  { %v642_v18 = vunpack.c.l.bf16 %v641_v17 }
 0x94a   :  { %1019 = vpow2.f32 %v881_v20 }
 0x952   :  { %v1018_v19 = vpop.eup %1017 }
 0x953   :  { %416 = vrot.lane.b32.xlu1 %v1018_v19, %s1133_s0 }
 0x954   :  { %v1020_v21 = vpop.eup %1019 }
 0x955   :  { %v410_v22 = vadd.f32 1.0, %v1020_v21 }
 0x957   :  { %1021 = vrcp.f32 %v410_v22 }
 0x961   :  { %v1022_v23 = vpop.eup %1021 }
 0x962   :  { %v414_v26 = vmul.f32 %v1022_v23, %v330_v6 }
 0x9c5   :  { %v417_v24 = vpop.permute.xlu1 %416 }
 0x9c6   :  { %v419_v25 = vmul.f32 %v1022_v23, %v417_v24 }
 0x9c8   :  { %421 = vrot.lane.b32.xlu0 %v419_v25, %s1137_s1 }
 0xa3a   :  { %v422_v28 = vpop.permute.xlu0 %421 }
 0xa3b   :  { %v424_v29 = vadd.f32 %v422_v28, %v414_v26 }
 0xa3d   :  { %1023 = vtanh.f32 %v424_v29 }
 0xa47   :  { %v1024_v30 = vpop.eup %1023 }
 0xa48   :  { %427 = vrot.lane.b32.xlu1 %v1024_v30, %s1133_s0 }
 0xaba   :  { %v428_v31 = vpop.permute.xlu1 %427 }
 0xabb   :  { %v430_v32 = vmul.f32 %v1022_v23, %v428_v31 }
 0xabd   :  { %v1261_v33 = vpack.c.bf16 %v430_v32, %v430_v32 }
 0xabf   :  { %455 = vrot.lane.b32.xlu0 %v1261_v33, %s1137_s1 }
 0xb31   :  { %v456_v34 = vpop.permute.xlu0 %455 }
 0xb32   :  { %951 = vmatmul.mubr.msk.bf16.vlgmr.msra.gmra.mrb[8].mxu0 %vm69_vm2, %v456_v34 }
 0xb33   :  { %963 = vmatpush3.bf16.msra.mxu0 %v1196_v1  ;;  %966 = vmatprep.mubr.msk.bf16.mxu0 %vm1136_vm1, %v1135_v0 }
 0xb34   :  { %964 = vmatprep.subr.bf16.mxu0 %v1135_v0 }
 0xb37   :  { %965 = vmatpush3.bf16.msra.mxu0 %v1199_v2 }
 0xc05   :  { %v494_v37 = vpop.f32.mrb[8].mxu0 }
 0xc06   :  { %v500_v38 = vadd.f32 %v494_v37, %v454_v36  ;;  %v952_v39 = vpop.f32.mrb[9].mxu0 }
 0xc07   :  { %v497_v40 = vpop.f32.mrb[10].mxu0 }
 0xc08   :  { %1025 = vtanh.f32 %v500_v38  ;;  %v953_v41 = vpop.f32.mrb[11].mxu0  ;;  %v883_v43 = vmul.f32 -1.442695, %v500_v38 }
 0xc09   :  { %v735_v41 = vld [vmem:[#allocation4 + $0x7] sm:$0x1] }
 0xc0a   :  { %1027 = vpow2.f32 %v883_v43 }
 0xc12   :  { %v1026_v42 = vpop.eup %1025 }
 0xc13   :  { %510 = vrot.lane.b32.xlu1 %v1026_v42, %s1133_s0  ;;  %v736_v42 = vunpack.c.l.bf16 %v735_v41 }
 0xc14   :  { %v1028_v44 = vpop.eup %1027 }
 0xc15   :  { %v504_v45 = vadd.f32 1.0, %v1028_v44 }
 0xc17   :  { %1029 = vrcp.f32 %v504_v45 }
 0xc21   :  { %v1030_v46 = vpop.eup %1029 }
 0xc22   :  { %v508_v50 = vmul.f32 %v1030_v46, %v424_v29 }
 0xc85   :  { %v511_v47 = vpop.permute.xlu1 %510 }
 0xc86   :  { %v513_v48 = vmul.f32 %v1030_v46, %v511_v47 }
 0xc88   :  { %515 = vrot.lane.b32.xlu0 %v513_v48, %s1137_s1 }
 0xcfa   :  { %v516_v51 = vpop.permute.xlu0 %515 }
 0xcfb   :  { %v518_v52 = vadd.f32 %v516_v51, %v508_v50 }
 0xcfd   :  { %1031 = vtanh.f32 %v518_v52 }
 0xd07   :  { %v1032_v53 = vpop.eup %1031 }
 0xd08   :  { %521 = vrot.lane.b32.xlu1 %v1032_v53, %s1133_s0  ;;  %v1138_v53 = vmov 1966171168  }
 0xd7a   :  { %v522_v54 = vpop.permute.xlu1 %521 }
 0xd7b   :  { %v524_v55 = vmul.f32 %v1030_v46, %v522_v54  ;;  %v152_v54 = vunpack.c.l.s4 %v1138_v53 }
 0xd7d   :  { %v1274_v56 = vpack.c.bf16 %v524_v55, %v524_v55  ;;  %v154_v55 = vlaneseq }
 0xd7f   :  { %549 = vrot.lane.b32.xlu0 %v1274_v56, %s1137_s1  ;;  %v155_v58 = vshrl.u32 %v154_v55, 7 }
 0xdf1   :  { %v550_v57 = vpop.permute.xlu0 %549 }
 0xdf2   :  { %959 = vmatmul.mubr.msk.bf16.vlgmr.msra.gmra.mrb[8].mxu1 %vm69_vm2, %v550_v57  ;;  %v153_v57 = vunpack.c.0.s8 %v152_v54 }
 0xdf3   :  { %971 = vmatpush3.bf16.msra.mxu1 %v1196_v1  ;;  %974 = vmatprep.mubr.msk.bf16.mxu1 %vm1136_vm1, %v1135_v0 }
 0xdf4   :  { %972 = vmatprep.subr.bf16.mxu1 %v1135_v0 }
 0xdf7   :  { %973 = vmatpush3.bf16.msra.mxu1 %v1199_v2 }
 0xec5   :  { %v588_v60 = vpop.f32.mrb[8].mxu1 }
 0xec6   :  { %v594_v61 = vadd.f32 %v588_v60, %v548_v59  ;;  %v960_v62 = vpop.f32.mrb[9].mxu1  ;;  %v156_v59 = vsub.s32 %v153_v57, %v155_v58 }
 0xec7   :  { %v591_v63 = vpop.f32.mrb[10].mxu1 }
 0xec8   :  { %1033 = vtanh.f32 %v594_v61  ;;  %v961_v3 = vpop.f32.mrb[11].mxu1  ;;  %v885_v5 = vmul.f32 -1.442695, %v594_v61  ;;  %v157_v62 = vrot.slane %v1219_v27, %v156_v59 }
 0xec9   :  { %v345_v3 = vrot.slane %v1247_v10, %v156_v59 }
 0xeca   :  { %1035 = vpow2.f32 %v885_v5  ;;  %v533_v5 = vrot.slane %v1274_v56, %v156_v59  ;;  %v251_v56 = vrot.slane %v1233_v49, %v156_v59 }
 0xed2   :  { %v1034_v4 = vpop.eup %1033 }
 0xed3   :  { %604 = vrot.lane.b32.xlu1 %v1034_v4, %s1133_s0  ;;  %v164_v4 = vrot.slane %v157_v62, %v156_v59 }
 0xed4   :  { %v1036_v1 = vpop.eup %1035 }
 0xed5   :  { %v598_v6 = vadd.f32 1.0, %v1036_v1  ;;  %v352_v1 = vrot.slane %v345_v3, %v156_v59 }
 0xed7   :  { %1037 = vrcp.f32 %v598_v6 }
 0xee1   :  { %v1038_v7 = vpop.eup %1037 }
 0xee2   :  { %v602_v2 = vmul.f32 %v1038_v7, %v518_v52 }
 0xf45   :  { %v605_v0 = vpop.permute.xlu1 %604 }
 0xf46   :  { %v607_v8 = vmul.f32 %v1038_v7, %v605_v0 }
 0xf48   :  { %609 = vrot.lane.b32.xlu0 %v607_v8, %s1137_s1 }
 0xfba   :  { %v610_v9 = vpop.permute.xlu0 %609 }
 0xfbb   :  { %v612_v11 = vadd.f32 %v610_v9, %v602_v2 }
 0xfbd   :  { %1039 = vtanh.f32 %v612_v11 }
 0xfc7   :  { %v1040_v12 = vpop.eup %1039 }
 0xfc8   :  { %615 = vrot.lane.b32.xlu1 %v1040_v12, %s1133_s0 }
0x103a   :  { %v616_v13 = vpop.permute.xlu1 %615 }
0x103b   :  { %v618_v14 = vmul.f32 %v1038_v7, %v616_v13  ;;  %v540_v7 = vrot.slane %v533_v5, %v156_v59  ;;  %v439_v13 = vrot.slane %v1261_v33, %v156_v59 }
0x103d   :  { %v1287_v15 = vpack.c.bf16 %v618_v14, %v618_v14 }
0x103f   :  { %643 = vrot.lane.b32.xlu0 %v1287_v15, %s1137_s1  ;;  %v627_v17 = vrot.slane %v1287_v15, %v156_v59 }
0x1041   :  { %v634_v49 = vrot.slane %v627_v17, %v156_v59 }
0x10b1   :  { %v644_v16 = vpop.permute.xlu0 %643 }
0x10b2   :  { %967 = vmatmul.mubr.msk.bf16.vlgmr.msra.gmra.mrb[12].mxu0 %vm69_vm2, %v644_v16  ;;  %v258_v16 = vrot.slane %v251_v56, %v156_v59 }
0x1185   :  { %v682_v19 = vpop.f32.mrb[12].mxu0 }
0x1186   :  { %v688_v20 = vadd.f32 %v682_v19, %v642_v18  ;;  %v968_v21 = vpop.f32.mrb[13].mxu0  ;;  %v446_v18 = vrot.slane %v439_v13, %v156_v59  ;;  %v1139_v19 = vmov 1983009808  }
0x1187   :  { %v685_v22 = vpop.f32.mrb[14].mxu0 }
0x1188   :  { %1041 = vtanh.f32 %v688_v20  ;;  %v969_v23 = vpop.f32.mrb[15].mxu0  ;;  %v887_v25 = vmul.f32 -1.442695, %v688_v20  ;;  %v830_v20 = vunpack.c.l.s4 %v1139_v19 }
0x118a   :  { %1043 = vpow2.f32 %v887_v25  ;;  %v831_v21 = vunpack.c.0.s8 %v830_v20 }
0x118c   :  { %v834_v23 = vsub.s32 %v831_v21, %v155_v58 }
0x1192   :  { %v1042_v24 = vpop.eup %1041 }
0x1193   :  { %698 = vrot.lane.b32.xlu1 %v1042_v24, %s1133_s0 }
0x1194   :  { %v1044_v26 = vpop.eup %1043 }
0x1195   :  { %v692_v28 = vadd.f32 1.0, %v1044_v26 }
0x1197   :  { %1045 = vrcp.f32 %v692_v28 }
0x11a1   :  { %v1046_v29 = vpop.eup %1045 }
0x11a2   :  { %v696_v32 = vmul.f32 %v1046_v29, %v612_v11 }
0x1205   :  { %v699_v30 = vpop.permute.xlu1 %698 }
0x1206   :  { %v701_v31 = vmul.f32 %v1046_v29, %v699_v30 }
0x1208   :  { %703 = vrot.lane.b32.xlu0 %v701_v31, %s1137_s1 }
0x127a   :  { %v704_v34 = vpop.permute.xlu0 %703 }
0x127b   :  { %v706_v35 = vadd.f32 %v704_v34, %v696_v32 }
0x127d   :  { %1047 = vtanh.f32 %v706_v35 }
0x1287   :  { %v1048_v36 = vpop.eup %1047 }
0x1288   :  { %709 = vrot.lane.b32.xlu1 %v1048_v36, %s1133_s0 }
0x12fa   :  { %v710_v37 = vpop.permute.xlu1 %709 }
0x12fb   :  { %v712_v38 = vmul.f32 %v1046_v29, %v710_v37 }
0x12fd   :  { %v713_v39 = vpack.c.bf16 %v712_v38, %v712_v38 }
0x12ff   :  { %737 = vrot.lane.b32.xlu0 %v713_v39, %s1137_s1  ;;  %v721_v6 = vrot.slane %v713_v39, %v156_v59 }
0x1301   :  { %v728_v0 = vrot.slane %v721_v6, %v156_v59 }
0x1371   :  { %v738_v40 = vpop.permute.xlu0 %737 }
0x1372   :  { %975 = vmatmul.mubr.msk.bf16.vlgmr.msra.gmra.mrb[12].mxu1 %vm69_vm2, %v738_v40 }
0x1445   :  { %v776_v43 = vpop.f32.mrb[12].mxu1 }
0x1446   :  { %v782_v44 = vadd.f32 %v776_v43, %v736_v42  ;;  %v976_v45 = vpop.f32.mrb[13].mxu1 }
0x1447   :  { %v779_v46 = vpop.f32.mrb[14].mxu1 }
0x1448   :  { %1049 = vtanh.f32 %v782_v44  ;;  %v977_v47 = vpop.f32.mrb[15].mxu1  ;;  %v889_v50 = vmul.f32 -1.442695, %v782_v44 }
0x144a   :  { %1051 = vpow2.f32 %v889_v50 }
0x1452   :  { %v1050_v48 = vpop.eup %1049 }
0x1453   :  { %792 = vrot.lane.b32.xlu1 %v1050_v48, %s1133_s0 }
0x1454   :  { %v1052_v51 = vpop.eup %1051 }
0x1455   :  { %v786_v52 = vadd.f32 1.0, %v1052_v51 }
0x1457   :  { %1053 = vrcp.f32 %v786_v52 }
0x1461   :  { %v1054_v60 = vpop.eup %1053 }
0x1462   :  { %v790_v27 = vmul.f32 %v1054_v60, %v706_v35 }
0x14c5   :  { %v793_v61 = vpop.permute.xlu1 %792 }
0x14c6   :  { %v795_v63 = vmul.f32 %v1054_v60, %v793_v61 }
0x14c8   :  { %797 = vrot.lane.b32.xlu0 %v795_v63, %s1137_s1 }
0x14cc   :  { %165 = vrot.lane.b32.xlu0 %v164_v4, %s1137_s1 }
0x14d0   :  { %353 = vrot.lane.b32.xlu0 %v352_v1, %s1137_s1 }
0x14d4   :  { %541 = vrot.lane.b32.xlu0 %v540_v7, %s1137_s1 }
0x14d8   :  { %729 = vrot.lane.b32.xlu0 %v728_v0, %s1137_s1 }
0x153a   :  { %v798_v8 = vpop.permute.xlu0 %797 }
0x153b   :  { %v800_v2 = vadd.f32 %v798_v8, %v790_v27 }
0x153d   :  { %1055 = vtanh.f32 %v800_v2  ;;  %v848_v30 = vrot.slane %v800_v2, %v834_v23 }
0x153e   :  { %v166_v10 = vpop.permute.xlu0 %165 }
0x153f   :  { %169 = vst.msk [vmem:[#allocation9] sm:$0x1] %vm168_vm3, %v166_v10 }
0x1542   :  { %v354_v9 = vpop.permute.xlu0 %353 }
0x1543   :  { %357 = vst.msk [vmem:[#allocation9 + $0x2] sm:$0x1] %vm168_vm3, %v354_v9 }
0x1546   :  { %v542_v11 = vpop.permute.xlu0 %541 }
0x1547   :  { %v1056_v12 = vpop.eup %1055  ;;  %545 = vst.msk [vmem:[#allocation9 + $0x4] sm:$0x1] %vm168_vm3, %v542_v11 }
0x1548   :  { %803 = vrot.lane.b32.xlu1 %v1056_v12, %s1133_s0 }
0x154a   :  { %v730_v14 = vpop.permute.xlu0 %729 }
0x154b   :  { %733 = vst.msk [vmem:[#allocation9 + $0x6] sm:$0x1] %vm168_vm3, %v730_v14 }
0x154c   :  { %259 = vrot.lane.b32.xlu1 %v258_v16, %s1137_s1 }
0x1550   :  { %447 = vrot.lane.b32.xlu1 %v446_v18, %s1137_s1 }
0x1554   :  { %635 = vrot.lane.b32.xlu1 %v634_v49, %s1137_s1 }
0x15ba   :  { %v804_v22 = vpop.permute.xlu1 %803 }
0x15bb   :  { %v806_v33 = vmul.f32 %v1054_v60, %v804_v22 }
0x15bd   :  { %v807_v24 = vpack.c.bf16 %v806_v33, %v806_v33  ;;  %v835_v25 = vrot.slane %v806_v33, %v834_v23 }
0x15be   :  { %v260_v26 = vpop.permute.xlu1 %259 }
0x15bf   :  { %v815_v28 = vrot.slane %v807_v24, %v156_v59  ;;  %263 = vst.msk [vmem:[#allocation9 + $0x1] sm:$0x1] %vm168_vm3, %v260_v26  ;;  %836 = vrot.lane.b32.xlu0 %v835_v25, %s1137_s1 }
0x15c1   :  { %v822_v15 = vrot.slane %v815_v28, %v156_v59 }
0x15c2   :  { %v448_v29 = vpop.permute.xlu1 %447 }
0x15c3   :  { %451 = vst.msk [vmem:[#allocation9 + $0x3] sm:$0x1] %vm168_vm3, %v448_v29  ;;  %823 = vrot.lane.b32.xlu1 %v822_v15, %s1137_s1 }
0x15c6   :  { %v636_v31 = vpop.permute.xlu1 %635 }
0x15c7   :  { %639 = vst.msk [vmem:[#allocation9 + $0x5] sm:$0x1] %vm168_vm3, %v636_v31  ;;  %849 = vrot.lane.b32.xlu1 %v848_v30, %s1140_s8 }
0x1631   :  { %v837_v32 = vpop.permute.xlu0 %836 }
0x1632   :  { %840 = vst.msk [vmem:[#allocation2] sm:$0x3] %vm45_vm0, %v837_v32 }
0x1635   :  { %v824_v34 = vpop.permute.xlu1 %823 }
0x1636   :  { %827 = vst.msk [vmem:[#allocation9 + $0x7] sm:$0x1] %vm168_vm3, %v824_v34 }
0x1637   :  { %1112 = shalt.err (!%p1109_p6)
}
0x1638   :  { %s1113_s14 = scalar_lea.hbm %s1342_s2, 128 }
0x1639   :  { %p1114_p7 = scmp.ne.s32.totalorder %s1342_s2, %s1113_s14  ;;  %p1117_p8 = scmp.lt.u32.totalorder %s1113_s14, %s1342_s2 }
0x163b   :  { %p1119_p9 = pnand %p1117_p8, %p1114_p7 }
0x163d   :  { %1122 = shalt.err (!%p1119_p9)
}
0x163e   :  { %864 = dma.vmem_to_hbm [thread:$0]  %s859_s10, 128, %s1342_s2, [#allocation6], %s1130_s19, %s1130_s19, %s1131_s20   ;;  %v850_v35 = vpop.permute.xlu1 %849 }
0x163f   :  { %852 = vst.msk [vmem:[#allocation3] sm:$0x3] %vm45_vm0, %v850_v35 }
0x1640   :  { %1127 = dma.done.wait [#allocation6], 128  }
0x1641   :  { %1128 = vsyncadd [#allocation6], 4294967168 }
0x1642   :  { %868 = vsyncpa [#allocation5], 1 }
0x1643   :  { %869 = vsyncpa [#allocation8], 1 }
0x1644   :  { %870 = vsyncpa [#allocation6], 1 }

</bundles_post_ra>
